<compile_context>
chip_gen: v7x
topology: tpu7x:2x2x1
jax: 0.10.0
libtpu: 0.0.40
codegen_flags: <defaults>
</compile_context>

<pallas_src>
import functools

import jax
import jax.numpy as jnp
import numpy as np
from jax.experimental import pallas as pl
from jax.experimental.pallas import tpu as pltpu


# ---------------------------------------------------------------------------
# Fused Pallas kernel: all LSTM layers + fc in one program.
# ---------------------------------------------------------------------------
def fused_forex_kernel(num_layers, hidden_dim, *refs):
    H = hidden_dim
    x_ref = refs[0]
    layer_refs = refs[1:1 + 3 * num_layers]          # (w_ih, w_hh, b) per layer
    fc_w_ref = refs[1 + 3 * num_layers]
    fc_b_ref = refs[2 + 3 * num_layers]
    out_ref = refs[3 + 3 * num_layers]

    B, T, Din = x_ref.shape

    def recurrence(xw_steps, w_hh):
        """xw_steps: list of T (B, 4H) precomputed x_t @ W_ih + b tiles.
        Runs the serial recurrence; returns list of T hidden states (B, H)."""
        h = jnp.zeros((B, H), jnp.float32)
        c = jnp.zeros((B, H), jnp.float32)
        hs = []
        for t in range(T):                            # static, fully unrolled
            gates = xw_steps[t] + jnp.dot(
                h, w_hh, preferred_element_type=jnp.float32)        # (B, 4H)
            # PyTorch gate order: i, f, g, o.
            # One sigmoid over the whole gate vreg (i/f/o come from slices of
            # it); one tanh only on the g chunk.
            sig = jax.nn.sigmoid(gates)                              # (B, 4H)
            i = sig[:, 0 * H:1 * H]
            f = sig[:, 1 * H:2 * H]
            o = sig[:, 3 * H:4 * H]
            g = jnp.tanh(gates[:, 2 * H:3 * H])
            c = f * c + i * g
            h = o * jnp.tanh(c)
            hs.append(h)
        return hs

    # ---- layer 0: hoisted input projection (one MXU matmul over all timesteps)
    w_ih0, w_hh0, b0 = layer_refs[0], layer_refs[1], layer_refs[2]
    x = x_ref[...]                                                   # (B, T, Din)
    xw = jnp.dot(x.reshape(B * T, Din), w_ih0[...],
                 preferred_element_type=jnp.float32) + b0[...]       # (B*T, 4H)
    xw = xw.reshape(B, T, 4 * H)
    xw_steps = [xw[:, t, :] for t in range(T)]
    hs = recurrence(xw_steps, w_hh0[...])

    # ---- layers 1..L-1: input is the previous layer's hidden sequence
    for l in range(1, num_layers):
        w_ih, w_hh, b = (layer_refs[3 * l], layer_refs[3 * l + 1],
                         layer_refs[3 * l + 2])
        # inter-layer dropout(p=0.2) is identity in eval mode
        h_cat = jnp.concatenate(hs, axis=0)                          # (T*B, H) time-major
        xw = jnp.dot(h_cat, w_ih[...],
                     preferred_element_type=jnp.float32) + b[...]    # (T*B, 4H)
        xw_steps = [xw[t * B:(t + 1) * B, :] for t in range(T)]      # contiguous rows
        hs = recurrence(xw_steps, w_hh[...])

    # ---- final Linear on out[:, -1, :] (dropout before fc is identity in eval)
    h_last = hs[-1]                                                  # (B, H)
    out_ref[...] = (
        jnp.dot(h_last, fc_w_ref[...], preferred_element_type=jnp.float32)
        + fc_b_ref[...]
    ).astype(out_ref.dtype)


# ---------------------------------------------------------------------------
# Wrapper: one pallas_call for the whole model.
# ---------------------------------------------------------------------------
def forex_lstm_forward(x, params):
    """x: (B, T, input_dim) — batch_first like the PyTorch module."""
    B, T, Din = x.shape
    H = params["lstm"][0]["w_hh"].shape[0]
    O = params["fc_w"].shape[1]
    num_layers = len(params["lstm"])

    inputs = [x]
    in_specs = [pl.BlockSpec((B, T, Din), lambda i: (0, 0, 0))]
    for layer in params["lstm"]:
        inputs += [layer["w_ih"], layer["w_hh"], layer["b"]]
        in_specs += [
            pl.BlockSpec(layer["w_ih"].shape, lambda i: (0, 0)),
            pl.BlockSpec(layer["w_hh"].shape, lambda i: (0, 0)),
            pl.BlockSpec(layer["b"].shape, lambda i: (0, 0)),
        ]
    inputs += [params["fc_w"], params["fc_b"]]
    in_specs += [
        pl.BlockSpec(params["fc_w"].shape, lambda i: (0, 0)),
        pl.BlockSpec(params["fc_b"].shape, lambda i: (0, 0)),
    ]

    kernel = functools.partial(fused_forex_kernel, num_layers, H)
    return pl.pallas_call(
        kernel,
        out_shape=jax.ShapeDtypeStruct((B, O), x.dtype),
        grid=(1,),
        in_specs=in_specs,
        out_specs=pl.BlockSpec((B, O), lambda i: (0, 0)),
        compiler_params=pltpu.CompilerParams(
            dimension_semantics=("arbitrary",)),
    )(*inputs)


# ---------------------------------------------------------------------------
# Deterministic parameter init (PyTorch-style uniform(-1/sqrt(H), 1/sqrt(H)))
# ---------------------------------------------------------------------------
def init_params(key, input_dim, hidden_dim, num_layers, output_dim):
    k = 1.0 / np.sqrt(hidden_dim)
    params = {"lstm": []}
    for layer in range(num_layers):
        d_in = input_dim if layer == 0 else hidden_dim
        key, k1, k2, k3, k4 = jax.random.split(key, 5)
        w_ih = jax.random.uniform(k1, (4 * hidden_dim, d_in), jnp.float32, -k, k)
        w_hh = jax.random.uniform(k2, (4 * hidden_dim, hidden_dim), jnp.float32, -k, k)
        b_ih = jax.random.uniform(k3, (4 * hidden_dim,), jnp.float32, -k, k)
        b_hh = jax.random.uniform(k4, (4 * hidden_dim,), jnp.float32, -k, k)
        params["lstm"].append({
            "w_ih": w_ih.T,                              # (d_in, 4H)
            "w_hh": w_hh.T,                              # (H, 4H)
            "b": (b_ih + b_hh).reshape(1, 4 * hidden_dim),
        })
    key, k5, k6 = jax.random.split(key, 3)
    fc_w = jax.random.uniform(k5, (output_dim, hidden_dim), jnp.float32, -k, k)
    fc_b = jax.random.uniform(k6, (output_dim,), jnp.float32, -k, k)
    params["fc_w"] = fc_w.T                              # (H, O)
    params["fc_b"] = fc_b.reshape(1, output_dim)
    return params


# ---------------------------------------------------------------------------
# Pure-JAX reference (for correctness check)
# ---------------------------------------------------------------------------
def reference_forward(x, params):
    B = x.shape[0]
    h_seq = jnp.transpose(x, (1, 0, 2))
    for layer in params["lstm"]:
        H = layer["w_hh"].shape[0]
        h = jnp.zeros((B, H), jnp.float32)
        c = jnp.zeros((B, H), jnp.float32)
        outs = []
        for t in range(h_seq.shape[0]):
            gates = h_seq[t] @ layer["w_ih"] + h @ layer["w_hh"] + layer["b"]
            i = jax.nn.sigmoid(gates[:, 0 * H:1 * H])
            f = jax.nn.sigmoid(gates[:, 1 * H:2 * H])
            g = jnp.tanh(gates[:, 2 * H:3 * H])
            o = jax.nn.sigmoid(gates[:, 3 * H:4 * H])
            c = f * c + i * g
            h = o * jnp.tanh(c)
            outs.append(h)
        h_seq = jnp.stack(outs, axis=0)
    return h_seq[-1] @ params["fc_w"] + params["fc_b"]


# ---------------------------------------------------------------------------
if __name__ == "__main__":
    input_dim, hidden_dim, num_layers, output_dim = 16, 32, 2, 4
    batch, seq = 2, 8

    key = jax.random.PRNGKey(0)
    key, xkey = jax.random.split(key)
    x = jax.random.normal(xkey, (batch, seq, input_dim), jnp.float32)
    params = init_params(key, input_dim, hidden_dim, num_layers, output_dim)

    out = forex_lstm_forward(x, params)
    out = jax.block_until_ready(out)

    ref = reference_forward(x, params)
    assert out.shape == (batch, output_dim)
    assert jnp.allclose(out, ref, atol=1e-2, rtol=1e-2), "mismatch vs reference"

    print("KERNEL_OK")
</pallas_src>

<mosaic_0001>
module attributes {stable_mosaic.version = 11 : i64} {
  func.func @fused_forex_kernel(%arg0: i32, %arg1: memref<2x8x16xf32, #tpu.memory_space<vmem>>, %arg2: memref<16x128xf32, #tpu.memory_space<vmem>>, %arg3: memref<32x128xf32, #tpu.memory_space<vmem>>, %arg4: memref<1x128xf32, #tpu.memory_space<vmem>>, %arg5: memref<32x128xf32, #tpu.memory_space<vmem>>, %arg6: memref<32x128xf32, #tpu.memory_space<vmem>>, %arg7: memref<1x128xf32, #tpu.memory_space<vmem>>, %arg8: memref<32x4xf32, #tpu.memory_space<vmem>>, %arg9: memref<1x4xf32, #tpu.memory_space<vmem>>, %arg10: memref<2x4xf32, #tpu.memory_space<vmem>>) attributes {dimension_semantics = [#tpu.dimension_semantics<arbitrary>], iteration_bounds = array<i64: 1>, scalar_prefetch = 0 : i64, scratch_operands = 0 : i64, tpu.core_type = #tpu.core_type<tc>, window_params = [{pipeline_mode = #tpu.pipeline_mode<synchronous>, transform_indices = @transform_0, window_bounds = array<i64: 2, 8, 16>}, {pipeline_mode = #tpu.pipeline_mode<synchronous>, transform_indices = @transform_1, window_bounds = array<i64: 16, 128>}, {pipeline_mode = #tpu.pipeline_mode<synchronous>, transform_indices = @transform_2, window_bounds = array<i64: 32, 128>}, {pipeline_mode = #tpu.pipeline_mode<synchronous>, transform_indices = @transform_3, window_bounds = array<i64: 1, 128>}, {pipeline_mode = #tpu.pipeline_mode<synchronous>, transform_indices = @transform_4, window_bounds = array<i64: 32, 128>}, {pipeline_mode = #tpu.pipeline_mode<synchronous>, transform_indices = @transform_5, window_bounds = array<i64: 32, 128>}, {pipeline_mode = #tpu.pipeline_mode<synchronous>, transform_indices = @transform_6, window_bounds = array<i64: 1, 128>}, {pipeline_mode = #tpu.pipeline_mode<synchronous>, transform_indices = @transform_7, window_bounds = array<i64: 32, 4>}, {pipeline_mode = #tpu.pipeline_mode<synchronous>, transform_indices = @transform_8, window_bounds = array<i64: 1, 4>}, {pipeline_mode = #tpu.pipeline_mode<synchronous>, transform_indices = @transform_9, window_bounds = array<i64: 2, 4>}]} {
    %c0 = arith.constant 0 : index
    %c0_0 = arith.constant 0 : index
    %c0_1 = arith.constant 0 : index
    %0 = vector.load %arg1[%c0, %c0_0, %c0_1] : memref<2x8x16xf32, #tpu.memory_space<vmem>>, vector<2x8x16xf32>
    %1 = vector.shape_cast %0 : vector<2x8x16xf32> to vector<16x16xf32>
    %c0_2 = arith.constant 0 : index
    %c0_3 = arith.constant 0 : index
    %2 = vector.load %arg2[%c0_2, %c0_3] : memref<16x128xf32, #tpu.memory_space<vmem>>, vector<16x128xf32>
    %cst = arith.constant dense<0.000000e+00> : vector<16x128xf32>
    %3 = tpu.matmul %1, %2, %cst {dimension_numbers = #tpu.dot_dimension_numbers<[1], [0], [0], [1], [0, 0, 1, 1], [], []>} : vector<16x16xf32>, vector<16x128xf32>, vector<16x128xf32> -> vector<16x128xf32>
    %c0_4 = arith.constant 0 : index
    %c0_5 = arith.constant 0 : index
    %4 = vector.load %arg4[%c0_4, %c0_5] : memref<1x128xf32, #tpu.memory_space<vmem>>, vector<1x128xf32>
    %5 = vector.broadcast %4 : vector<1x128xf32> to vector<16x128xf32>
    %6 = arith.addf %3, %5 : vector<16x128xf32>
    %7 = vector.shape_cast %6 : vector<16x128xf32> to vector<2x8x128xf32>
    %8 = vector.extract_strided_slice %7 {offsets = [0, 0, 0], sizes = [2, 1, 128], strides = [1, 1, 1]} : vector<2x8x128xf32> to vector<2x1x128xf32>
    %9 = vector.shape_cast %8 : vector<2x1x128xf32> to vector<2x128xf32>
    %10 = vector.extract_strided_slice %7 {offsets = [0, 1, 0], sizes = [2, 1, 128], strides = [1, 1, 1]} : vector<2x8x128xf32> to vector<2x1x128xf32>
    %11 = vector.shape_cast %10 : vector<2x1x128xf32> to vector<2x128xf32>
    %12 = vector.extract_strided_slice %7 {offsets = [0, 2, 0], sizes = [2, 1, 128], strides = [1, 1, 1]} : vector<2x8x128xf32> to vector<2x1x128xf32>
    %13 = vector.shape_cast %12 : vector<2x1x128xf32> to vector<2x128xf32>
    %14 = vector.extract_strided_slice %7 {offsets = [0, 3, 0], sizes = [2, 1, 128], strides = [1, 1, 1]} : vector<2x8x128xf32> to vector<2x1x128xf32>
    %15 = vector.shape_cast %14 : vector<2x1x128xf32> to vector<2x128xf32>
    %16 = vector.extract_strided_slice %7 {offsets = [0, 4, 0], sizes = [2, 1, 128], strides = [1, 1, 1]} : vector<2x8x128xf32> to vector<2x1x128xf32>
    %17 = vector.shape_cast %16 : vector<2x1x128xf32> to vector<2x128xf32>
    %18 = vector.extract_strided_slice %7 {offsets = [0, 5, 0], sizes = [2, 1, 128], strides = [1, 1, 1]} : vector<2x8x128xf32> to vector<2x1x128xf32>
    %19 = vector.shape_cast %18 : vector<2x1x128xf32> to vector<2x128xf32>
    %20 = vector.extract_strided_slice %7 {offsets = [0, 6, 0], sizes = [2, 1, 128], strides = [1, 1, 1]} : vector<2x8x128xf32> to vector<2x1x128xf32>
    %21 = vector.shape_cast %20 : vector<2x1x128xf32> to vector<2x128xf32>
    %22 = vector.extract_strided_slice %7 {offsets = [0, 7, 0], sizes = [2, 1, 128], strides = [1, 1, 1]} : vector<2x8x128xf32> to vector<2x1x128xf32>
    %23 = vector.shape_cast %22 : vector<2x1x128xf32> to vector<2x128xf32>
    %c0_6 = arith.constant 0 : index
    %c0_7 = arith.constant 0 : index
    %24 = vector.load %arg3[%c0_6, %c0_7] : memref<32x128xf32, #tpu.memory_space<vmem>>, vector<32x128xf32>
    %cst_8 = arith.constant 0.000000e+00 : f32
    %25 = vector.broadcast %cst_8 : f32 to vector<2x32xf32>
    %cst_9 = arith.constant 0.000000e+00 : f32
    %26 = vector.broadcast %cst_9 : f32 to vector<2x32xf32>
    %cst_10 = arith.constant dense<0.000000e+00> : vector<2x128xf32>
    %27 = tpu.matmul %25, %24, %cst_10 {dimension_numbers = #tpu.dot_dimension_numbers<[1], [0], [0], [1], [0, 0, 1, 1], [], []>} : vector<2x32xf32>, vector<32x128xf32>, vector<2x128xf32> -> vector<2x128xf32>
    %28 = arith.addf %9, %27 : vector<2x128xf32>
    %29 = arith.negf %28 : vector<2x128xf32>
    %30 = math.exp %29 : vector<2x128xf32>
    %cst_11 = arith.constant 1.000000e+00 : f32
    %31 = vector.broadcast %cst_11 : f32 to vector<2x128xf32>
    %32 = arith.addf %31, %30 : vector<2x128xf32>
    %33 = arith.divf %31, %32 : vector<2x128xf32>
    %34 = vector.extract_strided_slice %33 {offsets = [0, 0], sizes = [2, 32], strides = [1, 1]} : vector<2x128xf32> to vector<2x32xf32>
    %35 = vector.extract_strided_slice %33 {offsets = [0, 32], sizes = [2, 32], strides = [1, 1]} : vector<2x128xf32> to vector<2x32xf32>
    %36 = vector.extract_strided_slice %33 {offsets = [0, 96], sizes = [2, 32], strides = [1, 1]} : vector<2x128xf32> to vector<2x32xf32>
    %37 = vector.extract_strided_slice %28 {offsets = [0, 64], sizes = [2, 32], strides = [1, 1]} : vector<2x128xf32> to vector<2x32xf32>
    %38 = math.tanh %37 : vector<2x32xf32>
    %39 = arith.mulf %35, %26 : vector<2x32xf32>
    %40 = arith.mulf %34, %38 : vector<2x32xf32>
    %41 = arith.addf %39, %40 : vector<2x32xf32>
    %42 = math.tanh %41 : vector<2x32xf32>
    %43 = arith.mulf %36, %42 : vector<2x32xf32>
    %cst_12 = arith.constant dense<0.000000e+00> : vector<2x128xf32>
    %44 = tpu.matmul %43, %24, %cst_12 {dimension_numbers = #tpu.dot_dimension_numbers<[1], [0], [0], [1], [0, 0, 1, 1], [], []>} : vector<2x32xf32>, vector<32x128xf32>, vector<2x128xf32> -> vector<2x128xf32>
    %45 = arith.addf %11, %44 : vector<2x128xf32>
    %46 = arith.negf %45 : vector<2x128xf32>
    %47 = math.exp %46 : vector<2x128xf32>
    %cst_13 = arith.constant 1.000000e+00 : f32
    %48 = vector.broadcast %cst_13 : f32 to vector<2x128xf32>
    %49 = arith.addf %48, %47 : vector<2x128xf32>
    %50 = arith.divf %48, %49 : vector<2x128xf32>
    %51 = vector.extract_strided_slice %50 {offsets = [0, 0], sizes = [2, 32], strides = [1, 1]} : vector<2x128xf32> to vector<2x32xf32>
    %52 = vector.extract_strided_slice %50 {offsets = [0, 32], sizes = [2, 32], strides = [1, 1]} : vector<2x128xf32> to vector<2x32xf32>
    %53 = vector.extract_strided_slice %50 {offsets = [0, 96], sizes = [2, 32], strides = [1, 1]} : vector<2x128xf32> to vector<2x32xf32>
    %54 = vector.extract_strided_slice %45 {offsets = [0, 64], sizes = [2, 32], strides = [1, 1]} : vector<2x128xf32> to vector<2x32xf32>
    %55 = math.tanh %54 : vector<2x32xf32>
    %56 = arith.mulf %52, %41 : vector<2x32xf32>
    %57 = arith.mulf %51, %55 : vector<2x32xf32>
    %58 = arith.addf %56, %57 : vector<2x32xf32>
    %59 = math.tanh %58 : vector<2x32xf32>
    %60 = arith.mulf %53, %59 : vector<2x32xf32>
    %cst_14 = arith.constant dense<0.000000e+00> : vector<2x128xf32>
    %61 = tpu.matmul %60, %24, %cst_14 {dimension_numbers = #tpu.dot_dimension_numbers<[1], [0], [0], [1], [0, 0, 1, 1], [], []>} : vector<2x32xf32>, vector<32x128xf32>, vector<2x128xf32> -> vector<2x128xf32>
    %62 = arith.addf %13, %61 : vector<2x128xf32>
    %63 = arith.negf %62 : vector<2x128xf32>
    %64 = math.exp %63 : vector<2x128xf32>
    %cst_15 = arith.constant 1.000000e+00 : f32
    %65 = vector.broadcast %cst_15 : f32 to vector<2x128xf32>
    %66 = arith.addf %65, %64 : vector<2x128xf32>
    %67 = arith.divf %65, %66 : vector<2x128xf32>
    %68 = vector.extract_strided_slice %67 {offsets = [0, 0], sizes = [2, 32], strides = [1, 1]} : vector<2x128xf32> to vector<2x32xf32>
    %69 = vector.extract_strided_slice %67 {offsets = [0, 32], sizes = [2, 32], strides = [1, 1]} : vector<2x128xf32> to vector<2x32xf32>
    %70 = vector.extract_strided_slice %67 {offsets = [0, 96], sizes = [2, 32], strides = [1, 1]} : vector<2x128xf32> to vector<2x32xf32>
    %71 = vector.extract_strided_slice %62 {offsets = [0, 64], sizes = [2, 32], strides = [1, 1]} : vector<2x128xf32> to vector<2x32xf32>
    %72 = math.tanh %71 : vector<2x32xf32>
    %73 = arith.mulf %69, %58 : vector<2x32xf32>
    %74 = arith.mulf %68, %72 : vector<2x32xf32>
    %75 = arith.addf %73, %74 : vector<2x32xf32>
    %76 = math.tanh %75 : vector<2x32xf32>
    %77 = arith.mulf %70, %76 : vector<2x32xf32>
    %cst_16 = arith.constant dense<0.000000e+00> : vector<2x128xf32>
    %78 = tpu.matmul %77, %24, %cst_16 {dimension_numbers = #tpu.dot_dimension_numbers<[1], [0], [0], [1], [0, 0, 1, 1], [], []>} : vector<2x32xf32>, vector<32x128xf32>, vector<2x128xf32> -> vector<2x128xf32>
    %79 = arith.addf %15, %78 : vector<2x128xf32>
    %80 = arith.negf %79 : vector<2x128xf32>
    %81 = math.exp %80 : vector<2x128xf32>
    %cst_17 = arith.constant 1.000000e+00 : f32
    %82 = vector.broadcast %cst_17 : f32 to vector<2x128xf32>
    %83 = arith.addf %82, %81 : vector<2x128xf32>
    %84 = arith.divf %82, %83 : vector<2x128xf32>
    %85 = vector.extract_strided_slice %84 {offsets = [0, 0], sizes = [2, 32], strides = [1, 1]} : vector<2x128xf32> to vector<2x32xf32>
    %86 = vector.extract_strided_slice %84 {offsets = [0, 32], sizes = [2, 32], strides = [1, 1]} : vector<2x128xf32> to vector<2x32xf32>
    %87 = vector.extract_strided_slice %84 {offsets = [0, 96], sizes = [2, 32], strides = [1, 1]} : vector<2x128xf32> to vector<2x32xf32>
    %88 = vector.extract_strided_slice %79 {offsets = [0, 64], sizes = [2, 32], strides = [1, 1]} : vector<2x128xf32> to vector<2x32xf32>
    %89 = math.tanh %88 : vector<2x32xf32>
    %90 = arith.mulf %86, %75 : vector<2x32xf32>
    %91 = arith.mulf %85, %89 : vector<2x32xf32>
    %92 = arith.addf %90, %91 : vector<2x32xf32>
    %93 = math.tanh %92 : vector<2x32xf32>
    %94 = arith.mulf %87, %93 : vector<2x32xf32>
    %cst_18 = arith.constant dense<0.000000e+00> : vector<2x128xf32>
    %95 = tpu.matmul %94, %24, %cst_18 {dimension_numbers = #tpu.dot_dimension_numbers<[1], [0], [0], [1], [0, 0, 1, 1], [], []>} : vector<2x32xf32>, vector<32x128xf32>, vector<2x128xf32> -> vector<2x128xf32>
    %96 = arith.addf %17, %95 : vector<2x128xf32>
    %97 = arith.negf %96 : vector<2x128xf32>
    %98 = math.exp %97 : vector<2x128xf32>
    %cst_19 = arith.constant 1.000000e+00 : f32
    %99 = vector.broadcast %cst_19 : f32 to vector<2x128xf32>
    %100 = arith.addf %99, %98 : vector<2x128xf32>
    %101 = arith.divf %99, %100 : vector<2x128xf32>
    %102 = vector.extract_strided_slice %101 {offsets = [0, 0], sizes = [2, 32], strides = [1, 1]} : vector<2x128xf32> to vector<2x32xf32>
    %103 = vector.extract_strided_slice %101 {offsets = [0, 32], sizes = [2, 32], strides = [1, 1]} : vector<2x128xf32> to vector<2x32xf32>
    %104 = vector.extract_strided_slice %101 {offsets = [0, 96], sizes = [2, 32], strides = [1, 1]} : vector<2x128xf32> to vector<2x32xf32>
    %105 = vector.extract_strided_slice %96 {offsets = [0, 64], sizes = [2, 32], strides = [1, 1]} : vector<2x128xf32> to vector<2x32xf32>
    %106 = math.tanh %105 : vector<2x32xf32>
    %107 = arith.mulf %103, %92 : vector<2x32xf32>
    %108 = arith.mulf %102, %106 : vector<2x32xf32>
    %109 = arith.addf %107, %108 : vector<2x32xf32>
    %110 = math.tanh %109 : vector<2x32xf32>
    %111 = arith.mulf %104, %110 : vector<2x32xf32>
    %cst_20 = arith.constant dense<0.000000e+00> : vector<2x128xf32>
    %112 = tpu.matmul %111, %24, %cst_20 {dimension_numbers = #tpu.dot_dimension_numbers<[1], [0], [0], [1], [0, 0, 1, 1], [], []>} : vector<2x32xf32>, vector<32x128xf32>, vector<2x128xf32> -> vector<2x128xf32>
    %113 = arith.addf %19, %112 : vector<2x128xf32>
    %114 = arith.negf %113 : vector<2x128xf32>
    %115 = math.exp %114 : vector<2x128xf32>
    %cst_21 = arith.constant 1.000000e+00 : f32
    %116 = vector.broadcast %cst_21 : f32 to vector<2x128xf32>
    %117 = arith.addf %116, %115 : vector<2x128xf32>
    %118 = arith.divf %116, %117 : vector<2x128xf32>
    %119 = vector.extract_strided_slice %118 {offsets = [0, 0], sizes = [2, 32], strides = [1, 1]} : vector<2x128xf32> to vector<2x32xf32>
    %120 = vector.extract_strided_slice %118 {offsets = [0, 32], sizes = [2, 32], strides = [1, 1]} : vector<2x128xf32> to vector<2x32xf32>
    %121 = vector.extract_strided_slice %118 {offsets = [0, 96], sizes = [2, 32], strides = [1, 1]} : vector<2x128xf32> to vector<2x32xf32>
    %122 = vector.extract_strided_slice %113 {offsets = [0, 64], sizes = [2, 32], strides = [1, 1]} : vector<2x128xf32> to vector<2x32xf32>
    %123 = math.tanh %122 : vector<2x32xf32>
    %124 = arith.mulf %120, %109 : vector<2x32xf32>
    %125 = arith.mulf %119, %123 : vector<2x32xf32>
    %126 = arith.addf %124, %125 : vector<2x32xf32>
    %127 = math.tanh %126 : vector<2x32xf32>
    %128 = arith.mulf %121, %127 : vector<2x32xf32>
    %cst_22 = arith.constant dense<0.000000e+00> : vector<2x128xf32>
    %129 = tpu.matmul %128, %24, %cst_22 {dimension_numbers = #tpu.dot_dimension_numbers<[1], [0], [0], [1], [0, 0, 1, 1], [], []>} : vector<2x32xf32>, vector<32x128xf32>, vector<2x128xf32> -> vector<2x128xf32>
    %130 = arith.addf %21, %129 : vector<2x128xf32>
    %131 = arith.negf %130 : vector<2x128xf32>
    %132 = math.exp %131 : vector<2x128xf32>
    %cst_23 = arith.constant 1.000000e+00 : f32
    %133 = vector.broadcast %cst_23 : f32 to vector<2x128xf32>
    %134 = arith.addf %133, %132 : vector<2x128xf32>
    %135 = arith.divf %133, %134 : vector<2x128xf32>
    %136 = vector.extract_strided_slice %135 {offsets = [0, 0], sizes = [2, 32], strides = [1, 1]} : vector<2x128xf32> to vector<2x32xf32>
    %137 = vector.extract_strided_slice %135 {offsets = [0, 32], sizes = [2, 32], strides = [1, 1]} : vector<2x128xf32> to vector<2x32xf32>
    %138 = vector.extract_strided_slice %135 {offsets = [0, 96], sizes = [2, 32], strides = [1, 1]} : vector<2x128xf32> to vector<2x32xf32>
    %139 = vector.extract_strided_slice %130 {offsets = [0, 64], sizes = [2, 32], strides = [1, 1]} : vector<2x128xf32> to vector<2x32xf32>
    %140 = math.tanh %139 : vector<2x32xf32>
    %141 = arith.mulf %137, %126 : vector<2x32xf32>
    %142 = arith.mulf %136, %140 : vector<2x32xf32>
    %143 = arith.addf %141, %142 : vector<2x32xf32>
    %144 = math.tanh %143 : vector<2x32xf32>
    %145 = arith.mulf %138, %144 : vector<2x32xf32>
    %cst_24 = arith.constant dense<0.000000e+00> : vector<2x128xf32>
    %146 = tpu.matmul %145, %24, %cst_24 {dimension_numbers = #tpu.dot_dimension_numbers<[1], [0], [0], [1], [0, 0, 1, 1], [], []>} : vector<2x32xf32>, vector<32x128xf32>, vector<2x128xf32> -> vector<2x128xf32>
    %147 = arith.addf %23, %146 : vector<2x128xf32>
    %148 = arith.negf %147 : vector<2x128xf32>
    %149 = math.exp %148 : vector<2x128xf32>
    %cst_25 = arith.constant 1.000000e+00 : f32
    %150 = vector.broadcast %cst_25 : f32 to vector<2x128xf32>
    %151 = arith.addf %150, %149 : vector<2x128xf32>
    %152 = arith.divf %150, %151 : vector<2x128xf32>
    %153 = vector.extract_strided_slice %152 {offsets = [0, 0], sizes = [2, 32], strides = [1, 1]} : vector<2x128xf32> to vector<2x32xf32>
    %154 = vector.extract_strided_slice %152 {offsets = [0, 32], sizes = [2, 32], strides = [1, 1]} : vector<2x128xf32> to vector<2x32xf32>
    %155 = vector.extract_strided_slice %152 {offsets = [0, 96], sizes = [2, 32], strides = [1, 1]} : vector<2x128xf32> to vector<2x32xf32>
    %156 = vector.extract_strided_slice %147 {offsets = [0, 64], sizes = [2, 32], strides = [1, 1]} : vector<2x128xf32> to vector<2x32xf32>
    %157 = math.tanh %156 : vector<2x32xf32>
    %158 = arith.mulf %154, %143 : vector<2x32xf32>
    %159 = arith.mulf %153, %157 : vector<2x32xf32>
    %160 = arith.addf %158, %159 : vector<2x32xf32>
    %161 = math.tanh %160 : vector<2x32xf32>
    %162 = arith.mulf %155, %161 : vector<2x32xf32>
    %163 = tpu.concatenate %43, %60, %77, %94, %111, %128, %145, %162 in 0 : vector<2x32xf32>, vector<2x32xf32>, vector<2x32xf32>, vector<2x32xf32>, vector<2x32xf32>, vector<2x32xf32>, vector<2x32xf32>, vector<2x32xf32> -> vector<16x32xf32>
    %c0_26 = arith.constant 0 : index
    %c0_27 = arith.constant 0 : index
    %164 = vector.load %arg5[%c0_26, %c0_27] : memref<32x128xf32, #tpu.memory_space<vmem>>, vector<32x128xf32>
    %cst_28 = arith.constant dense<0.000000e+00> : vector<16x128xf32>
    %165 = tpu.matmul %163, %164, %cst_28 {dimension_numbers = #tpu.dot_dimension_numbers<[1], [0], [0], [1], [0, 0, 1, 1], [], []>} : vector<16x32xf32>, vector<32x128xf32>, vector<16x128xf32> -> vector<16x128xf32>
    %c0_29 = arith.constant 0 : index
    %c0_30 = arith.constant 0 : index
    %166 = vector.load %arg7[%c0_29, %c0_30] : memref<1x128xf32, #tpu.memory_space<vmem>>, vector<1x128xf32>
    %167 = vector.broadcast %166 : vector<1x128xf32> to vector<16x128xf32>
    %168 = arith.addf %165, %167 : vector<16x128xf32>
    %169 = vector.extract_strided_slice %168 {offsets = [0, 0], sizes = [2, 128], strides = [1, 1]} : vector<16x128xf32> to vector<2x128xf32>
    %170 = vector.extract_strided_slice %168 {offsets = [2, 0], sizes = [2, 128], strides = [1, 1]} : vector<16x128xf32> to vector<2x128xf32>
    %171 = vector.extract_strided_slice %168 {offsets = [4, 0], sizes = [2, 128], strides = [1, 1]} : vector<16x128xf32> to vector<2x128xf32>
    %172 = vector.extract_strided_slice %168 {offsets = [6, 0], sizes = [2, 128], strides = [1, 1]} : vector<16x128xf32> to vector<2x128xf32>
    %173 = vector.extract_strided_slice %168 {offsets = [8, 0], sizes = [2, 128], strides = [1, 1]} : vector<16x128xf32> to vector<2x128xf32>
    %174 = vector.extract_strided_slice %168 {offsets = [10, 0], sizes = [2, 128], strides = [1, 1]} : vector<16x128xf32> to vector<2x128xf32>
    %175 = vector.extract_strided_slice %168 {offsets = [12, 0], sizes = [2, 128], strides = [1, 1]} : vector<16x128xf32> to vector<2x128xf32>
    %176 = vector.extract_strided_slice %168 {offsets = [14, 0], sizes = [2, 128], strides = [1, 1]} : vector<16x128xf32> to vector<2x128xf32>
    %c0_31 = arith.constant 0 : index
    %c0_32 = arith.constant 0 : index
    %177 = vector.load %arg6[%c0_31, %c0_32] : memref<32x128xf32, #tpu.memory_space<vmem>>, vector<32x128xf32>
    %cst_33 = arith.constant 0.000000e+00 : f32
    %178 = vector.broadcast %cst_33 : f32 to vector<2x32xf32>
    %cst_34 = arith.constant 0.000000e+00 : f32
    %179 = vector.broadcast %cst_34 : f32 to vector<2x32xf32>
    %cst_35 = arith.constant dense<0.000000e+00> : vector<2x128xf32>
    %180 = tpu.matmul %178, %177, %cst_35 {dimension_numbers = #tpu.dot_dimension_numbers<[1], [0], [0], [1], [0, 0, 1, 1], [], []>} : vector<2x32xf32>, vector<32x128xf32>, vector<2x128xf32> -> vector<2x128xf32>
    %181 = arith.addf %169, %180 : vector<2x128xf32>
    %182 = arith.negf %181 : vector<2x128xf32>
    %183 = math.exp %182 : vector<2x128xf32>
    %cst_36 = arith.constant 1.000000e+00 : f32
    %184 = vector.broadcast %cst_36 : f32 to vector<2x128xf32>
    %185 = arith.addf %184, %183 : vector<2x128xf32>
    %186 = arith.divf %184, %185 : vector<2x128xf32>
    %187 = vector.extract_strided_slice %186 {offsets = [0, 0], sizes = [2, 32], strides = [1, 1]} : vector<2x128xf32> to vector<2x32xf32>
    %188 = vector.extract_strided_slice %186 {offsets = [0, 32], sizes = [2, 32], strides = [1, 1]} : vector<2x128xf32> to vector<2x32xf32>
    %189 = vector.extract_strided_slice %186 {offsets = [0, 96], sizes = [2, 32], strides = [1, 1]} : vector<2x128xf32> to vector<2x32xf32>
    %190 = vector.extract_strided_slice %181 {offsets = [0, 64], sizes = [2, 32], strides = [1, 1]} : vector<2x128xf32> to vector<2x32xf32>
    %191 = math.tanh %190 : vector<2x32xf32>
    %192 = arith.mulf %188, %179 : vector<2x32xf32>
    %193 = arith.mulf %187, %191 : vector<2x32xf32>
    %194 = arith.addf %192, %193 : vector<2x32xf32>
    %195 = math.tanh %194 : vector<2x32xf32>
    %196 = arith.mulf %189, %195 : vector<2x32xf32>
    %cst_37 = arith.constant dense<0.000000e+00> : vector<2x128xf32>
    %197 = tpu.matmul %196, %177, %cst_37 {dimension_numbers = #tpu.dot_dimension_numbers<[1], [0], [0], [1], [0, 0, 1, 1], [], []>} : vector<2x32xf32>, vector<32x128xf32>, vector<2x128xf32> -> vector<2x128xf32>
    %198 = arith.addf %170, %197 : vector<2x128xf32>
    %199 = arith.negf %198 : vector<2x128xf32>
    %200 = math.exp %199 : vector<2x128xf32>
    %cst_38 = arith.constant 1.000000e+00 : f32
    %201 = vector.broadcast %cst_38 : f32 to vector<2x128xf32>
    %202 = arith.addf %201, %200 : vector<2x128xf32>
    %203 = arith.divf %201, %202 : vector<2x128xf32>
    %204 = vector.extract_strided_slice %203 {offsets = [0, 0], sizes = [2, 32], strides = [1, 1]} : vector<2x128xf32> to vector<2x32xf32>
    %205 = vector.extract_strided_slice %203 {offsets = [0, 32], sizes = [2, 32], strides = [1, 1]} : vector<2x128xf32> to vector<2x32xf32>
    %206 = vector.extract_strided_slice %203 {offsets = [0, 96], sizes = [2, 32], strides = [1, 1]} : vector<2x128xf32> to vector<2x32xf32>
    %207 = vector.extract_strided_slice %198 {offsets = [0, 64], sizes = [2, 32], strides = [1, 1]} : vector<2x128xf32> to vector<2x32xf32>
    %208 = math.tanh %207 : vector<2x32xf32>
    %209 = arith.mulf %205, %194 : vector<2x32xf32>
    %210 = arith.mulf %204, %208 : vector<2x32xf32>
    %211 = arith.addf %209, %210 : vector<2x32xf32>
    %212 = math.tanh %211 : vector<2x32xf32>
    %213 = arith.mulf %206, %212 : vector<2x32xf32>
    %cst_39 = arith.constant dense<0.000000e+00> : vector<2x128xf32>
    %214 = tpu.matmul %213, %177, %cst_39 {dimension_numbers = #tpu.dot_dimension_numbers<[1], [0], [0], [1], [0, 0, 1, 1], [], []>} : vector<2x32xf32>, vector<32x128xf32>, vector<2x128xf32> -> vector<2x128xf32>
    %215 = arith.addf %171, %214 : vector<2x128xf32>
    %216 = arith.negf %215 : vector<2x128xf32>
    %217 = math.exp %216 : vector<2x128xf32>
    %cst_40 = arith.constant 1.000000e+00 : f32
    %218 = vector.broadcast %cst_40 : f32 to vector<2x128xf32>
    %219 = arith.addf %218, %217 : vector<2x128xf32>
    %220 = arith.divf %218, %219 : vector<2x128xf32>
    %221 = vector.extract_strided_slice %220 {offsets = [0, 0], sizes = [2, 32], strides = [1, 1]} : vector<2x128xf32> to vector<2x32xf32>
    %222 = vector.extract_strided_slice %220 {offsets = [0, 32], sizes = [2, 32], strides = [1, 1]} : vector<2x128xf32> to vector<2x32xf32>
    %223 = vector.extract_strided_slice %220 {offsets = [0, 96], sizes = [2, 32], strides = [1, 1]} : vector<2x128xf32> to vector<2x32xf32>
    %224 = vector.extract_strided_slice %215 {offsets = [0, 64], sizes = [2, 32], strides = [1, 1]} : vector<2x128xf32> to vector<2x32xf32>
    %225 = math.tanh %224 : vector<2x32xf32>
    %226 = arith.mulf %222, %211 : vector<2x32xf32>
    %227 = arith.mulf %221, %225 : vector<2x32xf32>
    %228 = arith.addf %226, %227 : vector<2x32xf32>
    %229 = math.tanh %228 : vector<2x32xf32>
    %230 = arith.mulf %223, %229 : vector<2x32xf32>
    %cst_41 = arith.constant dense<0.000000e+00> : vector<2x128xf32>
    %231 = tpu.matmul %230, %177, %cst_41 {dimension_numbers = #tpu.dot_dimension_numbers<[1], [0], [0], [1], [0, 0, 1, 1], [], []>} : vector<2x32xf32>, vector<32x128xf32>, vector<2x128xf32> -> vector<2x128xf32>
    %232 = arith.addf %172, %231 : vector<2x128xf32>
    %233 = arith.negf %232 : vector<2x128xf32>
    %234 = math.exp %233 : vector<2x128xf32>
    %cst_42 = arith.constant 1.000000e+00 : f32
    %235 = vector.broadcast %cst_42 : f32 to vector<2x128xf32>
    %236 = arith.addf %235, %234 : vector<2x128xf32>
    %237 = arith.divf %235, %236 : vector<2x128xf32>
    %238 = vector.extract_strided_slice %237 {offsets = [0, 0], sizes = [2, 32], strides = [1, 1]} : vector<2x128xf32> to vector<2x32xf32>
    %239 = vector.extract_strided_slice %237 {offsets = [0, 32], sizes = [2, 32], strides = [1, 1]} : vector<2x128xf32> to vector<2x32xf32>
    %240 = vector.extract_strided_slice %237 {offsets = [0, 96], sizes = [2, 32], strides = [1, 1]} : vector<2x128xf32> to vector<2x32xf32>
    %241 = vector.extract_strided_slice %232 {offsets = [0, 64], sizes = [2, 32], strides = [1, 1]} : vector<2x128xf32> to vector<2x32xf32>
    %242 = math.tanh %241 : vector<2x32xf32>
    %243 = arith.mulf %239, %228 : vector<2x32xf32>
    %244 = arith.mulf %238, %242 : vector<2x32xf32>
    %245 = arith.addf %243, %244 : vector<2x32xf32>
    %246 = math.tanh %245 : vector<2x32xf32>
    %247 = arith.mulf %240, %246 : vector<2x32xf32>
    %cst_43 = arith.constant dense<0.000000e+00> : vector<2x128xf32>
    %248 = tpu.matmul %247, %177, %cst_43 {dimension_numbers = #tpu.dot_dimension_numbers<[1], [0], [0], [1], [0, 0, 1, 1], [], []>} : vector<2x32xf32>, vector<32x128xf32>, vector<2x128xf32> -> vector<2x128xf32>
    %249 = arith.addf %173, %248 : vector<2x128xf32>
    %250 = arith.negf %249 : vector<2x128xf32>
    %251 = math.exp %250 : vector<2x128xf32>
    %cst_44 = arith.constant 1.000000e+00 : f32
    %252 = vector.broadcast %cst_44 : f32 to vector<2x128xf32>
    %253 = arith.addf %252, %251 : vector<2x128xf32>
    %254 = arith.divf %252, %253 : vector<2x128xf32>
    %255 = vector.extract_strided_slice %254 {offsets = [0, 0], sizes = [2, 32], strides = [1, 1]} : vector<2x128xf32> to vector<2x32xf32>
    %256 = vector.extract_strided_slice %254 {offsets = [0, 32], sizes = [2, 32], strides = [1, 1]} : vector<2x128xf32> to vector<2x32xf32>
    %257 = vector.extract_strided_slice %254 {offsets = [0, 96], sizes = [2, 32], strides = [1, 1]} : vector<2x128xf32> to vector<2x32xf32>
    %258 = vector.extract_strided_slice %249 {offsets = [0, 64], sizes = [2, 32], strides = [1, 1]} : vector<2x128xf32> to vector<2x32xf32>
    %259 = math.tanh %258 : vector<2x32xf32>
    %260 = arith.mulf %256, %245 : vector<2x32xf32>
    %261 = arith.mulf %255, %259 : vector<2x32xf32>
    %262 = arith.addf %260, %261 : vector<2x32xf32>
    %263 = math.tanh %262 : vector<2x32xf32>
    %264 = arith.mulf %257, %263 : vector<2x32xf32>
    %cst_45 = arith.constant dense<0.000000e+00> : vector<2x128xf32>
    %265 = tpu.matmul %264, %177, %cst_45 {dimension_numbers = #tpu.dot_dimension_numbers<[1], [0], [0], [1], [0, 0, 1, 1], [], []>} : vector<2x32xf32>, vector<32x128xf32>, vector<2x128xf32> -> vector<2x128xf32>
    %266 = arith.addf %174, %265 : vector<2x128xf32>
    %267 = arith.negf %266 : vector<2x128xf32>
    %268 = math.exp %267 : vector<2x128xf32>
    %cst_46 = arith.constant 1.000000e+00 : f32
    %269 = vector.broadcast %cst_46 : f32 to vector<2x128xf32>
    %270 = arith.addf %269, %268 : vector<2x128xf32>
    %271 = arith.divf %269, %270 : vector<2x128xf32>
    %272 = vector.extract_strided_slice %271 {offsets = [0, 0], sizes = [2, 32], strides = [1, 1]} : vector<2x128xf32> to vector<2x32xf32>
    %273 = vector.extract_strided_slice %271 {offsets = [0, 32], sizes = [2, 32], strides = [1, 1]} : vector<2x128xf32> to vector<2x32xf32>
    %274 = vector.extract_strided_slice %271 {offsets = [0, 96], sizes = [2, 32], strides = [1, 1]} : vector<2x128xf32> to vector<2x32xf32>
    %275 = vector.extract_strided_slice %266 {offsets = [0, 64], sizes = [2, 32], strides = [1, 1]} : vector<2x128xf32> to vector<2x32xf32>
    %276 = math.tanh %275 : vector<2x32xf32>
    %277 = arith.mulf %273, %262 : vector<2x32xf32>
    %278 = arith.mulf %272, %276 : vector<2x32xf32>
    %279 = arith.addf %277, %278 : vector<2x32xf32>
    %280 = math.tanh %279 : vector<2x32xf32>
    %281 = arith.mulf %274, %280 : vector<2x32xf32>
    %cst_47 = arith.constant dense<0.000000e+00> : vector<2x128xf32>
    %282 = tpu.matmul %281, %177, %cst_47 {dimension_numbers = #tpu.dot_dimension_numbers<[1], [0], [0], [1], [0, 0, 1, 1], [], []>} : vector<2x32xf32>, vector<32x128xf32>, vector<2x128xf32> -> vector<2x128xf32>
    %283 = arith.addf %175, %282 : vector<2x128xf32>
    %284 = arith.negf %283 : vector<2x128xf32>
    %285 = math.exp %284 : vector<2x128xf32>
    %cst_48 = arith.constant 1.000000e+00 : f32
    %286 = vector.broadcast %cst_48 : f32 to vector<2x128xf32>
    %287 = arith.addf %286, %285 : vector<2x128xf32>
    %288 = arith.divf %286, %287 : vector<2x128xf32>
    %289 = vector.extract_strided_slice %288 {offsets = [0, 0], sizes = [2, 32], strides = [1, 1]} : vector<2x128xf32> to vector<2x32xf32>
    %290 = vector.extract_strided_slice %288 {offsets = [0, 32], sizes = [2, 32], strides = [1, 1]} : vector<2x128xf32> to vector<2x32xf32>
    %291 = vector.extract_strided_slice %288 {offsets = [0, 96], sizes = [2, 32], strides = [1, 1]} : vector<2x128xf32> to vector<2x32xf32>
    %292 = vector.extract_strided_slice %283 {offsets = [0, 64], sizes = [2, 32], strides = [1, 1]} : vector<2x128xf32> to vector<2x32xf32>
    %293 = math.tanh %292 : vector<2x32xf32>
    %294 = arith.mulf %290, %279 : vector<2x32xf32>
    %295 = arith.mulf %289, %293 : vector<2x32xf32>
    %296 = arith.addf %294, %295 : vector<2x32xf32>
    %297 = math.tanh %296 : vector<2x32xf32>
    %298 = arith.mulf %291, %297 : vector<2x32xf32>
    %cst_49 = arith.constant dense<0.000000e+00> : vector<2x128xf32>
    %299 = tpu.matmul %298, %177, %cst_49 {dimension_numbers = #tpu.dot_dimension_numbers<[1], [0], [0], [1], [0, 0, 1, 1], [], []>} : vector<2x32xf32>, vector<32x128xf32>, vector<2x128xf32> -> vector<2x128xf32>
    %300 = arith.addf %176, %299 : vector<2x128xf32>
    %301 = arith.negf %300 : vector<2x128xf32>
    %302 = math.exp %301 : vector<2x128xf32>
    %cst_50 = arith.constant 1.000000e+00 : f32
    %303 = vector.broadcast %cst_50 : f32 to vector<2x128xf32>
    %304 = arith.addf %303, %302 : vector<2x128xf32>
    %305 = arith.divf %303, %304 : vector<2x128xf32>
    %306 = vector.extract_strided_slice %305 {offsets = [0, 0], sizes = [2, 32], strides = [1, 1]} : vector<2x128xf32> to vector<2x32xf32>
    %307 = vector.extract_strided_slice %305 {offsets = [0, 32], sizes = [2, 32], strides = [1, 1]} : vector<2x128xf32> to vector<2x32xf32>
    %308 = vector.extract_strided_slice %305 {offsets = [0, 96], sizes = [2, 32], strides = [1, 1]} : vector<2x128xf32> to vector<2x32xf32>
    %309 = vector.extract_strided_slice %300 {offsets = [0, 64], sizes = [2, 32], strides = [1, 1]} : vector<2x128xf32> to vector<2x32xf32>
    %310 = math.tanh %309 : vector<2x32xf32>
    %311 = arith.mulf %307, %296 : vector<2x32xf32>
    %312 = arith.mulf %306, %310 : vector<2x32xf32>
    %313 = arith.addf %311, %312 : vector<2x32xf32>
    %314 = math.tanh %313 : vector<2x32xf32>
    %315 = arith.mulf %308, %314 : vector<2x32xf32>
    %c0_51 = arith.constant 0 : index
    %c0_52 = arith.constant 0 : index
    %316 = vector.load %arg8[%c0_51, %c0_52] : memref<32x4xf32, #tpu.memory_space<vmem>>, vector<32x4xf32>
    %cst_53 = arith.constant dense<0.000000e+00> : vector<2x4xf32>
    %317 = tpu.matmul %315, %316, %cst_53 {dimension_numbers = #tpu.dot_dimension_numbers<[1], [0], [0], [1], [0, 0, 1, 1], [], []>} : vector<2x32xf32>, vector<32x4xf32>, vector<2x4xf32> -> vector<2x4xf32>
    %c0_54 = arith.constant 0 : index
    %c0_55 = arith.constant 0 : index
    %318 = vector.load %arg9[%c0_54, %c0_55] : memref<1x4xf32, #tpu.memory_space<vmem>>, vector<1x4xf32>
    %319 = vector.broadcast %318 : vector<1x4xf32> to vector<2x4xf32>
    %320 = arith.addf %317, %319 : vector<2x4xf32>
    %c0_56 = arith.constant 0 : index
    %c0_57 = arith.constant 0 : index
    %321 = vector.load %arg10[%c0_56, %c0_57] : memref<2x4xf32, #tpu.memory_space<vmem>>, vector<2x4xf32>
    tpu.vector_store %arg10[%c0_56, %c0_57], %320 {strides = array<i32>} : memref<2x4xf32, #tpu.memory_space<vmem>>, vector<2x4xf32>,
    return
  }
  func.func @transform_0(%arg0: i32) -> (i32, i32, i32) {
    %c0_i32 = arith.constant 0 : i32
    %c0_i32_0 = arith.constant 0 : i32
    %c0_i32_1 = arith.constant 0 : i32
    %c0_i32_2 = arith.constant 0 : i32
    return %c0_i32, %c0_i32_0, %c0_i32_1 : i32, i32, i32
  }
  func.func @transform_1(%arg0: i32) -> (i32, i32) {
    %c0_i32 = arith.constant 0 : i32
    %c0_i32_0 = arith.constant 0 : i32
    %c0_i32_1 = arith.constant 0 : i32
    return %c0_i32, %c0_i32_0 : i32, i32
  }
  func.func @transform_2(%arg0: i32) -> (i32, i32) {
    %c0_i32 = arith.constant 0 : i32
    %c0_i32_0 = arith.constant 0 : i32
    %c0_i32_1 = arith.constant 0 : i32
    return %c0_i32, %c0_i32_0 : i32, i32
  }
  func.func @transform_3(%arg0: i32) -> (i32, i32) {
    %c0_i32 = arith.constant 0 : i32
    %c0_i32_0 = arith.constant 0 : i32
    %c0_i32_1 = arith.constant 0 : i32
    return %c0_i32, %c0_i32_0 : i32, i32
  }
  func.func @transform_4(%arg0: i32) -> (i32, i32) {
    %c0_i32 = arith.constant 0 : i32
    %c0_i32_0 = arith.constant 0 : i32
    %c0_i32_1 = arith.constant 0 : i32
    return %c0_i32, %c0_i32_0 : i32, i32
  }
  func.func @transform_5(%arg0: i32) -> (i32, i32) {
    %c0_i32 = arith.constant 0 : i32
    %c0_i32_0 = arith.constant 0 : i32
    %c0_i32_1 = arith.constant 0 : i32
    return %c0_i32, %c0_i32_0 : i32, i32
  }
  func.func @transform_6(%arg0: i32) -> (i32, i32) {
    %c0_i32 = arith.constant 0 : i32
    %c0_i32_0 = arith.constant 0 : i32
    %c0_i32_1 = arith.constant 0 : i32
    return %c0_i32, %c0_i32_0 : i32, i32
  }
  func.func @transform_7(%arg0: i32) -> (i32, i32) {
    %c0_i32 = arith.constant 0 : i32
    %c0_i32_0 = arith.constant 0 : i32
    %c0_i32_1 = arith.constant 0 : i32
    return %c0_i32, %c0_i32_0 : i32, i32
  }
  func.func @transform_8(%arg0: i32) -> (i32, i32) {
    %c0_i32 = arith.constant 0 : i32
    %c0_i32_0 = arith.constant 0 : i32
    %c0_i32_1 = arith.constant 0 : i32
    return %c0_i32, %c0_i32_0 : i32, i32
  }
  func.func @transform_9(%arg0: i32) -> (i32, i32) {
    %c0_i32 = arith.constant 0 : i32
    %c0_i32_0 = arith.constant 0 : i32
    %c0_i32_1 = arith.constant 0 : i32
    return %c0_i32, %c0_i32_0 : i32, i32
  }
}

</mosaic_0001>

<bundles_post_ra>
// kernel: tpu_custom_call.1
= control target key start
LH: loop header
LB: loop body
LE: loop exit
PB: predicated region body
PF: predicated region fallthrough
CT: control target
= control target key end

     0   :  { %14 = vsyncpa [#allocation3], 0  ;;  %s3635_s0 = inlined_call_operand.hbm [shape: f32[2,8,16], index: 0, kind: input, shape index: {}]   ;;  %s3636_s1 = inlined_call_operand.hbm [shape: f32[16,128], index: 1, kind: input, shape index: {}]   ;;  %s3637_s2 = inlined_call_operand.vmem [shape: f32[32,128], index: 2, kind: input, shape index: {}]   ;;  %s3638_s3 = inlined_call_operand.vmem [shape: f32[1,128], index: 3, kind: input, shape index: {}]   ;;  %s3639_s4 = inlined_call_operand.hbm [shape: f32[32,128], index: 4, kind: input, shape index: {}]   ;;  %s3640_s5 = inlined_call_operand.hbm [shape: f32[32,128], index: 5, kind: input, shape index: {}]   ;;  %s3641_s6 = inlined_call_operand.vmem [shape: f32[1,128], index: 6, kind: input, shape index: {}]   ;;  %s3642_s7 = inlined_call_operand.vmem [shape: f32[32,4], index: 7, kind: input, shape index: {}]   ;;  %s3643_s8 = inlined_call_operand.vmem [shape: f32[1,4], index: 8, kind: input, shape index: {}]   ;;  %s3644_s9 = inlined_call_operand.hbm [shape: f32[2,4], index: 9, kind: output, shape index: {}]  }
   0x1   :  { %15 = vsyncpa [#allocation6], 0 }
   0x2   :  { %16 = vsyncpa [#allocation9], 0 }
   0x3   :  { %17 = vsyncpa [#allocation4], 0  ;;  %s3157_s30 = smov [#allocation5]   ;;  %s3158_s11 = smov [#allocation2]  }
   0x4   :  { %s35_s10 = sshll.u32 %s3157_s30, 4  ;;  %s23_s12 = sshll.u32 %s3158_s11, 4  ;;  %s36_s10 = int_to_ptr.vmem [resolvable:$true] %s35_s10  ;;  %s3219_s12 = int_to_ptr.vmem [resolvable:$true] %s23_s12 }
   0x5   :  { %s3039_s15 = scalar_lea.hbm %s3636_s1, 256 }
   0x6   :  { %p3040_p0 = scmp.ne.s32.totalorder %s3636_s1, %s3039_s15  ;;  %p3043_p1 = scmp.lt.u32.totalorder %s3039_s15, %s3636_s1 }
   0x8   :  { %p3045_p2 = pnand %p3043_p1, %p3040_p0 }
   0xa   :  { %3048 = shalt.err (!%p3045_p2)
}
   0xb   :  { %s3049_s20 = scalar_lea.vmem %s36_s10, 256  ;;  %p3054_p4 = scmp.lt.s32.totalorder %s36_s10, %s36_s10 }
   0xc   :  { %p3050_p3 = scmp.ne.s32.totalorder %s36_s10, %s3049_s20  ;;  %p3055_p5 = scmp.lt.s32.totalorder %s3049_s20, %s3049_s20 }
   0xe   :  { %p3056_p6 = por %p3055_p5, %p3054_p4 }
  0x10   :  { %p3057_p7 = pnand %p3056_p6, %p3050_p3 }
  0x12   :  { %3060 = shalt.err (!%p3057_p7)
}
  0x13   :  { %s3159_s21 = smov 128   ;;  %s3160_s22 = smov 8  }
  0x14   :  { %41 = dma.hbm_to_vmem [thread:$0]  %s3636_s1, 256, %s36_s10, [#allocation6], %s3159_s21, %s3159_s21, %s3160_s22  }
  0x15   :  { %s3061_s27 = scalar_lea.hbm %s3635_s0, 256 }
  0x16   :  { %p3062_p8 = scmp.ne.s32.totalorder %s3635_s0, %s3061_s27  ;;  %p3065_p9 = scmp.lt.u32.totalorder %s3061_s27, %s3635_s0 }
  0x18   :  { %p3067_p10 = pnand %p3065_p9, %p3062_p8 }
  0x1a   :  { %3070 = shalt.err (!%p3067_p10)
}
  0x1b   :  { %s3071_s13 = scalar_lea.vmem %s3219_s12, 256  ;;  %p3076_p12 = scmp.lt.s32.totalorder %s3219_s12, %s3219_s12 }
  0x1c   :  { %p3072_p11 = scmp.ne.s32.totalorder %s3219_s12, %s3071_s13  ;;  %p3077_p13 = scmp.lt.s32.totalorder %s3071_s13, %s3071_s13 }
  0x1e   :  { %p3078_p0 = por %p3077_p13, %p3076_p12 }
  0x20   :  { %p3079_p1 = pnand %p3078_p0, %p3072_p11 }
  0x22   :  { %3082 = shalt.err (!%p3079_p1)
}
  0x23   :  { %29 = dma.hbm_to_vmem [thread:$0]  %s3635_s0, 256, %s3219_s12, [#allocation3], %s3159_s21, %s3159_s21, %s3160_s22  }
  0x24   :  { %s3161_s14 = smov [#allocation7]   ;;  %s3162_s16 = smov [#allocation8]  }
  0x25   :  { %s51_s15 = sshll.u32 %s3161_s14, 4  ;;  %s63_s17 = sshll.u32 %s3162_s16, 4  ;;  %s52_s15 = int_to_ptr.vmem [resolvable:$true] %s51_s15  ;;  %s3256_s17 = int_to_ptr.vmem [resolvable:$true] %s63_s17 }
  0x26   :  { %s3083_s20 = scalar_lea.hbm %s3639_s4, 512 }
  0x27   :  { %p3084_p2 = scmp.ne.s32.totalorder %s3639_s4, %s3083_s20  ;;  %p3087_p3 = scmp.lt.u32.totalorder %s3083_s20, %s3639_s4 }
  0x29   :  { %p3089_p4 = pnand %p3087_p3, %p3084_p2 }
  0x2b   :  { %3092 = shalt.err (!%p3089_p4)
}
  0x2c   :  { %s3093_s0 = scalar_lea.vmem %s52_s15, 512  ;;  %p3098_p6 = scmp.lt.s32.totalorder %s52_s15, %s52_s15 }
  0x2d   :  { %p3094_p5 = scmp.ne.s32.totalorder %s52_s15, %s3093_s0  ;;  %p3099_p7 = scmp.lt.s32.totalorder %s3093_s0, %s3093_s0 }
  0x2f   :  { %p3100_p8 = por %p3099_p7, %p3098_p6 }
  0x31   :  { %p3101_p9 = pnand %p3100_p8, %p3094_p5 }
  0x33   :  { %3104 = shalt.err (!%p3101_p9)
}
  0x34   :  { %57 = dma.hbm_to_vmem [thread:$0]  %s3639_s4, 512, %s52_s15, [#allocation6], %s3159_s21, %s3159_s21, %s3160_s22  }
  0x35   :  { %s3105_s30 = scalar_lea.hbm %s3640_s5, 512 }
  0x36   :  { %p3106_p10 = scmp.ne.s32.totalorder %s3640_s5, %s3105_s30  ;;  %p3109_p11 = scmp.lt.u32.totalorder %s3105_s30, %s3640_s5 }
  0x38   :  { %p3111_p12 = pnand %p3109_p11, %p3106_p10 }
  0x3a   :  { %3114 = shalt.err (!%p3111_p12)
}
  0x3b   :  { %s3115_s14 = scalar_lea.vmem %s3256_s17, 512  ;;  %p3120_p0 = scmp.lt.s32.totalorder %s3256_s17, %s3256_s17 }
  0x3c   :  { %p3116_p13 = scmp.ne.s32.totalorder %s3256_s17, %s3115_s14  ;;  %p3121_p1 = scmp.lt.s32.totalorder %s3115_s14, %s3115_s14 }
  0x3e   :  { %p3122_p2 = por %p3121_p1, %p3120_p0 }
  0x40   :  { %p3123_p3 = pnand %p3122_p2, %p3116_p13 }
  0x42   :  { %3126 = shalt.err (!%p3123_p3)
}
  0x43   :  { %69 = dma.hbm_to_vmem [thread:$0]  %s3640_s5, 512, %s3256_s17, [#allocation9], %s3159_s21, %s3159_s21, %s3160_s22  }
  0x44   :  { %3149 = dma.done.wait [#allocation3], 256  }
  0x45   :  { %3150 = vsyncadd [#allocation3], 4294967040 }
  0x46   :  { %3151 = dma.done.wait [#allocation6], 768  }
  0x47   :  { %3152 = vsyncadd [#allocation6], 4294966528 }
  0x48   :  { %3153 = dma.done.wait [#allocation9], 512  }
  0x49   :  { %3154 = vsyncadd [#allocation9], 4294966784  ;;  %v3163_v0 = vmov 0.0|0.0   ;;  %vm3164_vm0 = vmmov 0   ;;  %v3165_v1 = vmov 0.0   ;;  %vm99_vm1 = vcmask 130048  }
  0x4a   :  { %2725 = vmatprep.subr.bf16.mxu1 %v3163_v0  ;;  %2531 = vmatprep.mubr.msk.f32.mxu1 %vm3164_vm0, %v3165_v1  ;;  %v90_v2 = vld [vmem:[#allocation5] sm:$0xff]  ;;  %v91_v3 = vld [vmem:[#allocation5 + $0x8] sm:$0xff]  ;;  %v181_v4 = vld [vmem:[%s3637_s2] sm:$0xff]  ;;  %s3166_s24 = smov 64   ;;  %vm316_vm2 = vcmask 1041409   ;;  %vm185_vm3 = vcmask 261120  }
  0x4b   :  { %v2721_v5 = vpack.c.bf16 %v91_v3, %v90_v2  ;;  %v182_v6 = vld [vmem:[%s3637_s2 + $0x8] sm:$0xff]  ;;  %v88_v7 = vld [vmem:[#allocation2] sm:$0xff]  ;;  %v183_v9 = vld [vmem:[%s3637_s2 + $0x10] sm:$0xff]  ;;  %vm1294_vm4 = vcmask 1043459   ;;  %vm1299_vm5 = vcmask 1045509   ;;  %vm1321_vm6 = vcmask 1041408  }
  0x4c   :  { %v3302_v8 = vpack.c.bf16 %v182_v6, %v181_v4  ;;  %2520 = vmatprep.mubr.msk.f32.mxu0 %vm99_vm1, %v88_v7  ;;  %v184_v10 = vld [vmem:[%s3637_s2 + $0x18] sm:$0xff]  ;;  %v89_v11 = vld [vmem:[#allocation2 + $0x8] sm:$0xff]  ;;  %v2375_v15 = vld [vmem:[%s3638_s3] ss:$0 sm:$0xff]  ;;  %s3167_s3 = smov 32   ;;  %vm1323_vm7 = vcmask 1043456  }
  0x4d   :  { %2722 = vmatprep.subr.bf16.mxu0 %v2721_v5  ;;  %v3312_v12 = vpack.c.bf16 %v184_v10, %v183_v9  ;;  %vm1304_vm8 = vcmask 1047559   ;;  %vm1325_vm9 = vcmask 1045504   ;;  %vm2356_vm10 = vcmask 25600  }
  0x4e   :  { %2727 = vmatpush3.bf16.msra.mxu1 %v3302_v8  ;;  %2724 = vmatpush3.bf16.msra.mxu0 %v2721_v5 }
  0x4f   :  { %2728 = vmatprep.subr.bf16.mxu1 %v3163_v0  ;;  %2731 = vmatprep.subr.bf16.mxu0 %v3163_v0 }
  0x51   :  { %2521 = vmatmul.mubr.msk.f32.vlgmr.msra.gmra.mrb[0].mxu0 %vm99_vm1, %v89_v11 }
  0x52   :  { %2730 = vmatpush3.bf16.msra.mxu1 %v3312_v12  ;;  %2733 = vmatpush3.bf16.msra.mxu0 %v3302_v8 }
  0x53   :  { %2734 = vmatprep.subr.bf16.mxu0 %v3163_v0  ;;  %2542 = vmatprep.mubr.msk.f32.mxu0 %vm3164_vm0, %v3165_v1 }
  0x54   :  { %2737 = vmatprep.subr.bf16.mxu1 %v3163_v0 }
  0x55   :  { %2532 = vmatmul.mubr.f32.vlgmr.msra.gmra.mrb[0].mxu1 %v3165_v1 }
  0x56   :  { %2736 = vmatpush3.bf16.msra.mxu0 %v3312_v12  ;;  %2739 = vmatpush3.bf16.msra.mxu1 %v3302_v8 }
  0x57   :  { %2740 = vmatprep.subr.bf16.mxu1 %v3163_v0  ;;  %2553 = vmatprep.mubr.msk.f32.mxu1 %vm3164_vm0, %v3165_v1 }
  0x58   :  { %2743 = vmatprep.subr.bf16.mxu0 %v3163_v0 }
  0x5a   :  { %2742 = vmatpush3.bf16.msra.mxu1 %v3312_v12 }
  0x5b   :  { %2749 = vmatprep.subr.bf16.mxu1 %v3163_v0 }
 0x124   :  { %v2522_v13 = vpop.f32.mrb[0].mxu0 }
 0x125   :  { %v172_v14 = vpop.f32.mrb[1].mxu0  ;;  %v3335_v16 = vadd.f32 %v2522_v13, %v2375_v15 }
 0x126   :  { %v3337_v20 = vadd.f32 %v2375_v15, %v172_v14 }
 0x128   :  { %v255_v17 = vpop.f32.mrb[0].mxu1 }
 0x129   :  { %v260_v18 = vrot.slane %v255_v17, 1  ;;  %v2533_v19 = vpop.f32.mrb[1].mxu1  ;;  %v263_v22 = vadd.f32 %v255_v17, %v3337_v20 }
 0x12b   :  { %v264_v21 = vadd.f32 %v260_v18, %v3335_v16  ;;  %v2378_v26 = vmul.f32 -1.442695, %v263_v22 }
 0x12d   :  { %2847 = vtanh.f32 %v264_v21  ;;  %v2379_v25 = vmul.f32 -1.442695, %v264_v21 }
 0x12e   :  { %2849 = vtanh.f32 %v263_v22 }
 0x12f   :  { %2851 = vpow2.f32 %v2379_v25 }
 0x130   :  { %2853 = vpow2.f32 %v2378_v26 }
 0x137   :  { %v2848_v23 = vpop.eup %2847 }
 0x138   :  { %285 = vrot.lane.b32.xlu0 %v2848_v23, %s3166_s24  ;;  %v2850_v24 = vpop.eup %2849 }
 0x139   :  { %v2852_v27 = vpop.eup %2851 }
 0x13a   :  { %v272_v28 = vadd.f32 1.0, %v2852_v27  ;;  %v2854_v29 = vpop.eup %2853 }
 0x13b   :  { %v271_v30 = vadd.f32 1.0, %v2854_v29 }
 0x13c   :  { %283 = vrot.lane.b32.xlu0 %v2850_v24, %s3166_s24  ;;  %2855 = vrcp.f32 %v272_v28 }
 0x13d   :  { %2857 = vrcp.f32 %v271_v30 }
 0x146   :  { %v2856_v31 = vpop.eup %2855 }
 0x147   :  { %v2858_v34 = vpop.eup %2857  ;;  %v280_v37 = vmul.f32 0.0, %v2856_v31 }
 0x148   :  { %v279_v40 = vmul.f32 0.0, %v2858_v34 }
 0x1aa   :  { %v286_v32 = vpop.permute.xlu0 %285 }
 0x1ab   :  { %v290_v33 = vmul.f32 %v2856_v31, %v286_v32 }
 0x1ad   :  { %295 = vrot.lane.b32.xlu1 %v290_v33, %s3167_s3 }
 0x1ae   :  { %v284_v35 = vpop.permute.xlu0 %283 }
 0x1af   :  { %v289_v36 = vmul.f32 %v2858_v34, %v284_v35 }
 0x1b1   :  { %293 = vrot.lane.b32.xlu1 %v289_v36, %s3167_s3 }
 0x21f   :  { %v296_v38 = vpop.permute.xlu1 %295 }
 0x220   :  { %v300_v39 = vadd.f32 %v296_v38, %v280_v37 }
 0x222   :  { %2859 = vtanh.f32 %v300_v39  ;;  %v415_v10 = vrot.slane %v300_v39, 7 }
 0x223   :  { %v294_v41 = vpop.permute.xlu1 %293 }
 0x224   :  { %v299_v42 = vadd.f32 %v294_v41, %v279_v40 }
 0x226   :  { %2861 = vtanh.f32 %v299_v42  ;;  %v414_v13 = vrot.slane %v299_v42, 7 }
 0x22c   :  { %v2860_v43 = vpop.eup %2859 }
 0x22d   :  { %307 = vrot.lane.b32.xlu0 %v2860_v43, %s3166_s24 }
 0x230   :  { %v2862_v44 = vpop.eup %2861 }
 0x231   :  { %305 = vrot.lane.b32.xlu1 %v2862_v44, %s3166_s24 }
 0x29f   :  { %v308_v45 = vpop.permute.xlu0 %307 }
 0x2a0   :  { %v312_v46 = vmul.f32 %v2856_v31, %v308_v45 }
 0x2a2   :  { %v315_v48 = vrot.slane %v312_v46, 7 }
 0x2a3   :  { %v306_v47 = vpop.permute.xlu1 %305 }
 0x2a4   :  { %v311_v49 = vmul.f32 %v2858_v34, %v306_v47 }
 0x2a6   :  { %v3348_v50 = vsel %vm316_vm2, %v315_v48, %v311_v49 }
 0x2a7   :  { %318 = vrot.lane.b32.xlu0 %v3348_v50, %s3167_s3 }
 0x319   :  { %v319_v51 = vpop.permute.xlu0 %318 }
 0x31a   :  { %2543 = vmatmul.mubr.msk.f32.vlgmr.msra.gmra.mrb[2].mxu0 %vm185_vm3, %v319_v51 }
 0x31b   :  { %2745 = vmatpush3.bf16.msra.mxu0 %v3302_v8  ;;  %2564 = vmatprep.mubr.msk.f32.mxu0 %vm3164_vm0, %v3165_v1 }
 0x31c   :  { %2746 = vmatprep.subr.bf16.mxu0 %v3163_v0 }
 0x31f   :  { %2748 = vmatpush3.bf16.msra.mxu0 %v3312_v12 }
 0x320   :  { %2755 = vmatprep.subr.bf16.mxu0 %v3163_v0 }
 0x3ed   :  { %v388_v52 = vpop.f32.mrb[2].mxu0 }
 0x3ee   :  { %v393_v53 = vrot.slane %v388_v52, 7  ;;  %v397_v54 = vadd.f32 %v388_v52, %v3335_v16  ;;  %v2544_v55 = vpop.f32.mrb[3].mxu0 }
 0x3f0   :  { %v396_v56 = vadd.f32 %v393_v53, %v3337_v20  ;;  %2863 = vtanh.f32 %v397_v54  ;;  %v2382_v59 = vmul.f32 -1.442695, %v397_v54 }
 0x3f2   :  { %2865 = vtanh.f32 %v396_v56  ;;  %v2381_v60 = vmul.f32 -1.442695, %v396_v56 }
 0x3f3   :  { %2867 = vpow2.f32 %v2382_v59 }
 0x3f4   :  { %2869 = vpow2.f32 %v2381_v60 }
 0x3fa   :  { %v2864_v57 = vpop.eup %2863 }
 0x3fb   :  { %424 = vrot.lane.b32.xlu0 %v2864_v57, %s3166_s24 }
 0x3fc   :  { %v2866_v58 = vpop.eup %2865 }
 0x3fd   :  { %422 = vrot.lane.b32.xlu1 %v2866_v58, %s3166_s24  ;;  %v2868_v61 = vpop.eup %2867 }
 0x3fe   :  { %v2870_v62 = vpop.eup %2869  ;;  %v405_v63 = vadd.f32 1.0, %v2868_v61 }
 0x3ff   :  { %v404_v2 = vadd.f32 1.0, %v2870_v62 }
 0x400   :  { %2871 = vrcp.f32 %v405_v63 }
 0x401   :  { %2873 = vrcp.f32 %v404_v2 }
 0x40a   :  { %v2872_v3 = vpop.eup %2871 }
 0x40b   :  { %v2874_v6 = vpop.eup %2873  ;;  %v419_v11 = vmul.f32 %v2872_v3, %v415_v10 }
 0x40c   :  { %v418_v17 = vmul.f32 %v2874_v6, %v414_v13 }
 0x46d   :  { %v425_v4 = vpop.permute.xlu0 %424 }
 0x46e   :  { %v429_v5 = vmul.f32 %v2872_v3, %v425_v4 }
 0x46f   :  { %v423_v7 = vpop.permute.xlu1 %422 }
 0x470   :  { %434 = vrot.lane.b32.xlu0 %v429_v5, %s3167_s3  ;;  %v428_v9 = vmul.f32 %v2874_v6, %v423_v7 }
 0x472   :  { %432 = vrot.lane.b32.xlu1 %v428_v9, %s3167_s3 }
 0x4e2   :  { %v435_v14 = vpop.permute.xlu0 %434 }
 0x4e3   :  { %v439_v15 = vadd.f32 %v435_v14, %v419_v11 }
 0x4e4   :  { %v433_v18 = vpop.permute.xlu1 %432 }
 0x4e5   :  { %2875 = vtanh.f32 %v439_v15  ;;  %v438_v19 = vadd.f32 %v433_v18, %v418_v17  ;;  %v554_v55 = vrot.slane %v439_v15, 7 }
 0x4e7   :  { %2877 = vtanh.f32 %v438_v19  ;;  %v553_v54 = vrot.slane %v438_v19, 7 }
 0x4ef   :  { %v2876_v21 = vpop.eup %2875 }
 0x4f0   :  { %446 = vrot.lane.b32.xlu0 %v2876_v21, %s3166_s24 }
 0x4f1   :  { %v2878_v22 = vpop.eup %2877 }
 0x4f2   :  { %444 = vrot.lane.b32.xlu1 %v2878_v22, %s3166_s24 }
 0x562   :  { %v447_v23 = vpop.permute.xlu0 %446 }
 0x563   :  { %v451_v24 = vmul.f32 %v2872_v3, %v447_v23 }
 0x564   :  { %v445_v25 = vpop.permute.xlu1 %444 }
 0x565   :  { %v450_v26 = vmul.f32 %v2874_v6, %v445_v25  ;;  %v1293_v27 = vrot.slane %v451_v24, 6 }
 0x567   :  { %v454_v28 = vrot.slane %v450_v26, 1  ;;  %v1292_v29 = vrot.slane %v450_v26, 7 }
 0x569   :  { %v3368_v30 = vsel %vm1294_vm4, %v1293_v27, %v1292_v29  ;;  %v455_v31 = vsel %vm316_vm2, %v451_v24, %v454_v28 }
 0x56a   :  { %456 = vrot.lane.b32.xlu1 %v455_v31, %s3167_s3  ;;  %v1322_v14 = vsel %vm1321_vm6, %v3348_v50, %v3368_v30 }
 0x5dc   :  { %v457_v32 = vpop.permute.xlu1 %456 }
 0x5dd   :  { %2554 = vmatmul.mubr.msk.f32.vlgmr.msra.gmra.mrb[2].mxu1 %vm185_vm3, %v457_v32 }
 0x5de   :  { %2751 = vmatpush3.bf16.msra.mxu1 %v3302_v8  ;;  %2575 = vmatprep.mubr.msk.f32.mxu1 %vm3164_vm0, %v3165_v1 }
 0x5df   :  { %2752 = vmatprep.subr.bf16.mxu1 %v3163_v0 }
 0x5e2   :  { %2754 = vmatpush3.bf16.msra.mxu1 %v3312_v12 }
 0x5e3   :  { %2761 = vmatprep.subr.bf16.mxu1 %v3163_v0 }
 0x6b0   :  { %v526_v33 = vpop.f32.mrb[2].mxu1 }
 0x6b1   :  { %v531_v34 = vrot.slane %v526_v33, 6  ;;  %v532_v35 = vrot.slane %v526_v33, 7  ;;  %v2555_v36 = vpop.f32.mrb[3].mxu1 }
 0x6b3   :  { %v535_v37 = vadd.f32 %v531_v34, %v3337_v20  ;;  %v536_v38 = vadd.f32 %v532_v35, %v3335_v16 }
 0x6b5   :  { %2879 = vtanh.f32 %v535_v37  ;;  %v2384_v41 = vmul.f32 -1.442695, %v535_v37  ;;  %v2385_v42 = vmul.f32 -1.442695, %v536_v38 }
 0x6b6   :  { %2881 = vtanh.f32 %v536_v38 }
 0x6b7   :  { %2883 = vpow2.f32 %v2384_v41 }
 0x6b8   :  { %2885 = vpow2.f32 %v2385_v42 }
 0x6bf   :  { %v2880_v39 = vpop.eup %2879 }
 0x6c0   :  { %v2882_v40 = vpop.eup %2881  ;;  %561 = vrot.lane.b32.xlu0 %v2880_v39, %s3166_s24 }
 0x6c1   :  { %563 = vrot.lane.b32.xlu1 %v2882_v40, %s3166_s24  ;;  %v2884_v43 = vpop.eup %2883 }
 0x6c2   :  { %v2886_v44 = vpop.eup %2885  ;;  %v543_v45 = vadd.f32 1.0, %v2884_v43 }
 0x6c3   :  { %v544_v46 = vadd.f32 1.0, %v2886_v44 }
 0x6c4   :  { %2887 = vrcp.f32 %v543_v45 }
 0x6c5   :  { %2889 = vrcp.f32 %v544_v46 }
 0x6ce   :  { %v2888_v47 = vpop.eup %2887 }
 0x6cf   :  { %v2890_v49 = vpop.eup %2889  ;;  %v557_v56 = vmul.f32 %v2888_v47, %v553_v54 }
 0x6d0   :  { %v558_v57 = vmul.f32 %v2890_v49, %v554_v55 }
 0x732   :  { %v562_v48 = vpop.permute.xlu0 %561 }
 0x733   :  { %v564_v51 = vpop.permute.xlu1 %563  ;;  %v567_v52 = vmul.f32 %v2888_v47, %v562_v48 }
 0x734   :  { %v568_v53 = vmul.f32 %v2890_v49, %v564_v51 }
 0x735   :  { %571 = vrot.lane.b32.xlu0 %v567_v52, %s3167_s3 }
 0x736   :  { %573 = vrot.lane.b32.xlu1 %v568_v53, %s3167_s3 }
 0x7a7   :  { %v572_v58 = vpop.permute.xlu0 %571 }
 0x7a8   :  { %v574_v59 = vpop.permute.xlu1 %573  ;;  %v3385_v60 = vadd.f32 %v572_v58, %v557_v56 }
 0x7a9   :  { %v3387_v61 = vadd.f32 %v574_v59, %v558_v57 }
 0x7aa   :  { %2891 = vtanh.f32 %v3385_v60  ;;  %v693_v38 = vrot.slane %v3385_v60, 7 }
 0x7ab   :  { %2893 = vtanh.f32 %v3387_v61  ;;  %v694_v39 = vrot.slane %v3387_v61, 7 }
 0x7b4   :  { %v2892_v62 = vpop.eup %2891 }
 0x7b5   :  { %v2894_v63 = vpop.eup %2893  ;;  %583 = vrot.lane.b32.xlu0 %v2892_v62, %s3166_s24 }
 0x7b6   :  { %585 = vrot.lane.b32.xlu1 %v2894_v63, %s3166_s24 }
 0x827   :  { %v584_v2 = vpop.permute.xlu0 %583 }
 0x828   :  { %v586_v3 = vpop.permute.xlu1 %585  ;;  %v589_v4 = vmul.f32 %v2888_v47, %v584_v2 }
 0x829   :  { %v590_v5 = vmul.f32 %v2890_v49, %v586_v3 }
 0x82a   :  { %v593_v6 = vrot.slane %v589_v4, 2  ;;  %v1297_v7 = vrot.slane %v589_v4, 6 }
 0x82b   :  { %v594_v9 = vrot.slane %v590_v5, 1  ;;  %v1298_v10 = vrot.slane %v590_v5, 5 }
 0x82d   :  { %v595_v11 = vsel %vm316_vm2, %v594_v9, %v593_v6  ;;  %v1300_v13 = vsel %vm1299_vm5, %v1298_v10, %v1297_v7 }
 0x82e   :  { %596 = vrot.lane.b32.xlu0 %v595_v11, %s3167_s3  ;;  %v3400_v15 = vsel %vm1323_vm7, %v1322_v14, %v1300_v13 }
 0x8a0   :  { %v597_v17 = vpop.permute.xlu0 %596 }
 0x8a1   :  { %2565 = vmatmul.mubr.msk.f32.vlgmr.msra.gmra.mrb[4].mxu0 %vm185_vm3, %v597_v17 }
 0x8a2   :  { %2757 = vmatpush3.bf16.msra.mxu0 %v3302_v8  ;;  %2586 = vmatprep.mubr.msk.f32.mxu0 %vm3164_vm0, %v3165_v1 }
 0x8a3   :  { %2758 = vmatprep.subr.bf16.mxu0 %v3163_v0 }
 0x8a6   :  { %2760 = vmatpush3.bf16.msra.mxu0 %v3312_v12 }
 0x8a7   :  { %2767 = vmatprep.subr.bf16.mxu0 %v3163_v0 }
 0x974   :  { %v666_v50 = vpop.f32.mrb[4].mxu0 }
 0x975   :  { %v671_v18 = vrot.slane %v666_v50, 5  ;;  %v672_v19 = vrot.slane %v666_v50, 6  ;;  %v2566_v21 = vpop.f32.mrb[5].mxu0 }
 0x977   :  { %v675_v22 = vadd.f32 %v671_v18, %v3337_v20  ;;  %v676_v23 = vadd.f32 %v672_v19, %v3335_v16 }
 0x979   :  { %2895 = vtanh.f32 %v675_v22  ;;  %v2387_v26 = vmul.f32 -1.442695, %v675_v22  ;;  %v2388_v27 = vmul.f32 -1.442695, %v676_v23 }
 0x97a   :  { %2897 = vtanh.f32 %v676_v23 }
 0x97b   :  { %2899 = vpow2.f32 %v2387_v26 }
 0x97c   :  { %2901 = vpow2.f32 %v2388_v27 }
 0x983   :  { %v2896_v24 = vpop.eup %2895 }
 0x984   :  { %v2898_v25 = vpop.eup %2897  ;;  %701 = vrot.lane.b32.xlu1 %v2896_v24, %s3166_s24 }
 0x985   :  { %703 = vrot.lane.b32.xlu0 %v2898_v25, %s3166_s24  ;;  %v2900_v28 = vpop.eup %2899 }
 0x986   :  { %v2902_v29 = vpop.eup %2901  ;;  %v683_v30 = vadd.f32 1.0, %v2900_v28 }
 0x987   :  { %v684_v31 = vadd.f32 1.0, %v2902_v29 }
 0x988   :  { %2903 = vrcp.f32 %v683_v30 }
 0x989   :  { %2905 = vrcp.f32 %v684_v31 }
 0x992   :  { %v2904_v32 = vpop.eup %2903 }
 0x993   :  { %v2906_v34 = vpop.eup %2905  ;;  %v697_v40 = vmul.f32 %v2904_v32, %v693_v38 }
 0x994   :  { %v698_v41 = vmul.f32 %v2906_v34, %v694_v39 }
 0x9f6   :  { %v702_v33 = vpop.permute.xlu1 %701 }
 0x9f7   :  { %v704_v35 = vpop.permute.xlu0 %703  ;;  %v707_v36 = vmul.f32 %v2904_v32, %v702_v33 }
 0x9f8   :  { %v708_v37 = vmul.f32 %v2906_v34, %v704_v35 }
 0x9f9   :  { %711 = vrot.lane.b32.xlu1 %v707_v36, %s3167_s3 }
 0x9fa   :  { %713 = vrot.lane.b32.xlu0 %v708_v37, %s3167_s3 }
 0xa6b   :  { %v712_v42 = vpop.permute.xlu1 %711 }
 0xa6c   :  { %v714_v43 = vpop.permute.xlu0 %713  ;;  %v717_v44 = vadd.f32 %v712_v42, %v697_v40 }
 0xa6d   :  { %v718_v45 = vadd.f32 %v714_v43, %v698_v41 }
 0xa6e   :  { %2907 = vtanh.f32 %v717_v44  ;;  %v833_v22 = vrot.slane %v717_v44, 7 }
 0xa6f   :  { %2909 = vtanh.f32 %v718_v45  ;;  %v834_v23 = vrot.slane %v718_v45, 7 }
 0xa78   :  { %v2908_v46 = vpop.eup %2907 }
 0xa79   :  { %v2910_v47 = vpop.eup %2909  ;;  %723 = vrot.lane.b32.xlu1 %v2908_v46, %s3166_s24 }
 0xa7a   :  { %725 = vrot.lane.b32.xlu0 %v2910_v47, %s3166_s24 }
 0xaeb   :  { %v724_v48 = vpop.permute.xlu1 %723 }
 0xaec   :  { %v726_v49 = vpop.permute.xlu0 %725  ;;  %v729_v51 = vmul.f32 %v2904_v32, %v724_v48 }
 0xaed   :  { %v730_v52 = vmul.f32 %v2906_v34, %v726_v49 }
 0xaee   :  { %v733_v53 = vrot.slane %v729_v51, 3  ;;  %v1302_v54 = vrot.slane %v729_v51, 5 }
 0xaef   :  { %v734_v55 = vrot.slane %v730_v52, 2  ;;  %v1303_v56 = vrot.slane %v730_v52, 4 }
 0xaf1   :  { %v735_v57 = vsel %vm316_vm2, %v734_v55, %v733_v53  ;;  %v1305_v58 = vsel %vm1304_vm8, %v1303_v56, %v1302_v54 }
 0xaf2   :  { %736 = vrot.lane.b32.xlu1 %v735_v57, %s3167_s3  ;;  %v3424_v59 = vsel %vm1325_vm9, %v3400_v15, %v1305_v58 }
 0xb64   :  { %v737_v60 = vpop.permute.xlu1 %736 }
 0xb65   :  { %2576 = vmatmul.mubr.msk.f32.vlgmr.msra.gmra.mrb[4].mxu1 %vm185_vm3, %v737_v60 }
 0xb66   :  { %2763 = vmatpush3.bf16.msra.mxu1 %v3302_v8  ;;  %2597 = vmatprep.mubr.msk.f32.mxu1 %vm3164_vm0, %v3165_v1 }
 0xb67   :  { %2764 = vmatprep.subr.bf16.mxu1 %v3163_v0 }
 0xb6a   :  { %2766 = vmatpush3.bf16.msra.mxu1 %v3312_v12 }
 0xc38   :  { %v806_v61 = vpop.f32.mrb[4].mxu1 }
 0xc39   :  { %v811_v62 = vrot.slane %v806_v61, 4  ;;  %v812_v63 = vrot.slane %v806_v61, 5  ;;  %v2577_v2 = vpop.f32.mrb[5].mxu1 }
 0xc3b   :  { %v815_v3 = vadd.f32 %v811_v62, %v3337_v20  ;;  %v816_v4 = vadd.f32 %v812_v63, %v3335_v16 }
 0xc3d   :  { %2911 = vtanh.f32 %v815_v3  ;;  %v2390_v7 = vmul.f32 -1.442695, %v815_v3  ;;  %v2391_v9 = vmul.f32 -1.442695, %v816_v4 }
 0xc3e   :  { %2913 = vtanh.f32 %v816_v4 }
 0xc3f   :  { %2915 = vpow2.f32 %v2390_v7 }
 0xc40   :  { %2917 = vpow2.f32 %v2391_v9 }
 0xc47   :  { %v2912_v5 = vpop.eup %2911 }
 0xc48   :  { %v2914_v6 = vpop.eup %2913  ;;  %841 = vrot.lane.b32.xlu0 %v2912_v5, %s3166_s24 }
 0xc49   :  { %843 = vrot.lane.b32.xlu1 %v2914_v6, %s3166_s24  ;;  %v2916_v10 = vpop.eup %2915 }
 0xc4a   :  { %v2918_v11 = vpop.eup %2917  ;;  %v823_v13 = vadd.f32 1.0, %v2916_v10 }
 0xc4b   :  { %v824_v14 = vadd.f32 1.0, %v2918_v11 }
 0xc4c   :  { %2919 = vrcp.f32 %v823_v13 }
 0xc4d   :  { %2921 = vrcp.f32 %v824_v14 }
 0xc56   :  { %v2920_v15 = vpop.eup %2919 }
 0xc57   :  { %v2922_v50 = vpop.eup %2921  ;;  %v837_v24 = vmul.f32 %v2920_v15, %v833_v22 }
 0xc58   :  { %v838_v25 = vmul.f32 %v2922_v50, %v834_v23 }
 0xcba   :  { %v842_v17 = vpop.permute.xlu0 %841 }
 0xcbb   :  { %v844_v18 = vpop.permute.xlu1 %843  ;;  %v847_v19 = vmul.f32 %v2920_v15, %v842_v17 }
 0xcbc   :  { %v848_v21 = vmul.f32 %v2922_v50, %v844_v18 }
 0xcbd   :  { %851 = vrot.lane.b32.xlu0 %v847_v19, %s3167_s3 }
 0xcbe   :  { %853 = vrot.lane.b32.xlu1 %v848_v21, %s3167_s3 }
 0xd2f   :  { %v852_v26 = vpop.permute.xlu0 %851 }
 0xd30   :  { %v854_v27 = vpop.permute.xlu1 %853  ;;  %v857_v28 = vadd.f32 %v852_v26, %v837_v24 }
 0xd31   :  { %v858_v29 = vadd.f32 %v854_v27, %v838_v25 }
 0xd32   :  { %2923 = vtanh.f32 %v857_v28  ;;  %v973_v60 = vrot.slane %v857_v28, 7 }
 0xd33   :  { %2925 = vtanh.f32 %v858_v29  ;;  %v974_v61 = vrot.slane %v858_v29, 7 }
 0xd3c   :  { %v2924_v30 = vpop.eup %2923 }
 0xd3d   :  { %v2926_v31 = vpop.eup %2925  ;;  %863 = vrot.lane.b32.xlu0 %v2924_v30, %s3166_s24 }
 0xd3e   :  { %865 = vrot.lane.b32.xlu1 %v2926_v31, %s3166_s24 }
 0xdaf   :  { %v864_v32 = vpop.permute.xlu0 %863 }
 0xdb0   :  { %v866_v33 = vpop.permute.xlu1 %865  ;;  %v869_v34 = vmul.f32 %v2920_v15, %v864_v32 }
 0xdb1   :  { %v870_v35 = vmul.f32 %v2922_v50, %v866_v33 }
 0xdb2   :  { %v873_v36 = vrot.slane %v869_v34, 4 }
 0xdb3   :  { %v874_v37 = vrot.slane %v870_v35, 3 }
 0xdb5   :  { %v3441_v38 = vsel %vm316_vm2, %v874_v37, %v873_v36 }
 0xdb6   :  { %876 = vrot.lane.b32.xlu0 %v3441_v38, %s3167_s3 }
 0xe28   :  { %v877_v39 = vpop.permute.xlu0 %876 }
 0xe29   :  { %2587 = vmatmul.mubr.msk.f32.vlgmr.msra.gmra.mrb[6].mxu0 %vm185_vm3, %v877_v39 }
 0xe2a   :  { %2769 = vmatpush3.bf16.msra.mxu0 %v3302_v8  ;;  %2608 = vmatprep.mubr.msk.f32.mxu0 %vm3164_vm0, %v3165_v1 }
 0xe2b   :  { %2770 = vmatprep.subr.bf16.mxu0 %v3163_v0 }
 0xe2e   :  { %2772 = vmatpush3.bf16.msra.mxu0 %v3312_v12 }
 0xe2f   :  { %2781 = vmatprep.subr.bf16.mxu0 %v3163_v0 }
 0xefc   :  { %v946_v40 = vpop.f32.mrb[6].mxu0 }
 0xefd   :  { %v951_v41 = vrot.slane %v946_v40, 3  ;;  %v952_v42 = vrot.slane %v946_v40, 4  ;;  %v2588_v43 = vpop.f32.mrb[7].mxu0 }
 0xeff   :  { %v955_v44 = vadd.f32 %v951_v41, %v3337_v20  ;;  %v956_v45 = vadd.f32 %v952_v42, %v3335_v16 }
 0xf01   :  { %2927 = vtanh.f32 %v955_v44  ;;  %v2393_v47 = vmul.f32 -1.442695, %v955_v44  ;;  %v2394_v12 = vmul.f32 -1.442695, %v956_v45 }
 0xf02   :  { %2929 = vtanh.f32 %v956_v45 }
 0xf03   :  { %2931 = vpow2.f32 %v2393_v47 }
 0xf04   :  { %2933 = vpow2.f32 %v2394_v12 }
 0xf0b   :  { %v2928_v8 = vpop.eup %2927 }
 0xf0c   :  { %v2930_v46 = vpop.eup %2929  ;;  %981 = vrot.lane.b32.xlu1 %v2928_v8, %s3166_s24 }
 0xf0d   :  { %983 = vrot.lane.b32.xlu0 %v2930_v46, %s3166_s24  ;;  %v2932_v48 = vpop.eup %2931 }
 0xf0e   :  { %v2934_v49 = vpop.eup %2933  ;;  %v963_v51 = vadd.f32 1.0, %v2932_v48 }
 0xf0f   :  { %v964_v52 = vadd.f32 1.0, %v2934_v49 }
 0xf10   :  { %2935 = vrcp.f32 %v963_v51 }
 0xf11   :  { %2937 = vrcp.f32 %v964_v52 }
 0xf1a   :  { %v2936_v53 = vpop.eup %2935 }
 0xf1b   :  { %v2938_v55 = vpop.eup %2937  ;;  %v977_v62 = vmul.f32 %v2936_v53, %v973_v60 }
 0xf1c   :  { %v978_v63 = vmul.f32 %v2938_v55, %v974_v61 }
 0xf7e   :  { %v982_v54 = vpop.permute.xlu1 %981 }
 0xf7f   :  { %v984_v56 = vpop.permute.xlu0 %983  ;;  %v987_v57 = vmul.f32 %v2936_v53, %v982_v54 }
 0xf80   :  { %v988_v58 = vmul.f32 %v2938_v55, %v984_v56 }
 0xf81   :  { %991 = vrot.lane.b32.xlu1 %v987_v57, %s3167_s3 }
 0xf82   :  { %993 = vrot.lane.b32.xlu0 %v988_v58, %s3167_s3 }
 0xff3   :  { %v992_v2 = vpop.permute.xlu1 %991 }
 0xff4   :  { %v994_v3 = vpop.permute.xlu0 %993  ;;  %v997_v4 = vadd.f32 %v992_v2, %v977_v62 }
 0xff5   :  { %v998_v5 = vadd.f32 %v994_v3, %v978_v63 }
 0xff6   :  { %2939 = vtanh.f32 %v997_v4  ;;  %v1113_v43 = vrot.slane %v997_v4, 7 }
 0xff7   :  { %2941 = vtanh.f32 %v998_v5  ;;  %v1114_v44 = vrot.slane %v998_v5, 7 }
0x1000   :  { %v2940_v6 = vpop.eup %2939 }
0x1001   :  { %v2942_v7 = vpop.eup %2941  ;;  %1003 = vrot.lane.b32.xlu1 %v2940_v6, %s3166_s24 }
0x1002   :  { %1005 = vrot.lane.b32.xlu0 %v2942_v7, %s3166_s24 }
0x1073   :  { %v1004_v9 = vpop.permute.xlu1 %1003 }
0x1074   :  { %v1006_v10 = vpop.permute.xlu0 %1005  ;;  %v1009_v11 = vmul.f32 %v2936_v53, %v1004_v9 }
0x1075   :  { %v1010_v13 = vmul.f32 %v2938_v55, %v1006_v10 }
0x1076   :  { %v1013_v14 = vrot.slane %v1009_v11, 5  ;;  %v1308_v15 = vrot.slane %v1009_v11, 3 }
0x1077   :  { %v1014_v17 = vrot.slane %v1010_v13, 4  ;;  %v1309_v50 = vrot.slane %v1010_v13, 2 }
0x1079   :  { %v1310_v18 = vsel %vm1294_vm4, %v1309_v50, %v1308_v15  ;;  %v1015_v19 = vsel %vm316_vm2, %v1014_v17, %v1013_v14 }
0x107a   :  { %1016 = vrot.lane.b32.xlu1 %v1015_v19, %s3167_s3  ;;  %v1327_v63 = vsel %vm1321_vm6, %v3441_v38, %v1310_v18 }
0x10ec   :  { %v1017_v21 = vpop.permute.xlu1 %1016 }
0x10ed   :  { %2598 = vmatmul.mubr.msk.f32.vlgmr.msra.gmra.mrb[6].mxu1 %vm185_vm3, %v1017_v21 }
0x11c0   :  { %v1086_v22 = vpop.f32.mrb[6].mxu1 }
0x11c1   :  { %v1091_v23 = vrot.slane %v1086_v22, 2  ;;  %v1092_v24 = vrot.slane %v1086_v22, 3  ;;  %v2599_v25 = vpop.f32.mrb[7].mxu1 }
0x11c3   :  { %v1095_v26 = vadd.f32 %v1091_v23, %v3337_v20  ;;  %v1096_v27 = vadd.f32 %v1092_v24, %v3335_v16 }
0x11c5   :  { %2943 = vtanh.f32 %v1095_v26  ;;  %v2396_v30 = vmul.f32 -1.442695, %v1095_v26  ;;  %v2397_v31 = vmul.f32 -1.442695, %v1096_v27 }
0x11c6   :  { %2945 = vtanh.f32 %v1096_v27 }
0x11c7   :  { %2947 = vpow2.f32 %v2396_v30 }
0x11c8   :  { %2949 = vpow2.f32 %v2397_v31 }
0x11cf   :  { %v2944_v28 = vpop.eup %2943 }
0x11d0   :  { %v2946_v29 = vpop.eup %2945  ;;  %1121 = vrot.lane.b32.xlu0 %v2944_v28, %s3166_s24 }
0x11d1   :  { %1123 = vrot.lane.b32.xlu1 %v2946_v29, %s3166_s24  ;;  %v2948_v32 = vpop.eup %2947 }
0x11d2   :  { %v2950_v33 = vpop.eup %2949  ;;  %v1103_v34 = vadd.f32 1.0, %v2948_v32  ;;  %v1330_v32 = vld [vmem:[#allocation7] sm:$0xff] }
0x11d3   :  { %v1104_v35 = vadd.f32 1.0, %v2950_v33  ;;  %v1331_v33 = vld [vmem:[#allocation7 + $0x8] sm:$0xff] }
0x11d4   :  { %2951 = vrcp.f32 %v1103_v34  ;;  %v1426_v34 = vld [vmem:[#allocation8] sm:$0xff] }
0x11d5   :  { %2953 = vrcp.f32 %v1104_v35  ;;  %v2773_v35 = vpack.c.bf16 %v1331_v33, %v1330_v32 }
0x11d7   :  { %2774 = vmatprep.subr.bf16.mxu1 %v2773_v35 }
0x11d8   :  { %2776 = vmatpush3.bf16.msra.mxu1 %v2773_v35 }
0x11de   :  { %v2952_v36 = vpop.eup %2951 }
0x11df   :  { %v2954_v39 = vpop.eup %2953  ;;  %v1117_v45 = vmul.f32 %v2952_v36, %v1113_v43  ;;  %v1429_v43 = vld [vmem:[#allocation8 + $0x18] sm:$0xff] }
0x11e0   :  { %v1118_v8 = vmul.f32 %v2954_v39, %v1114_v44 }
0x1242   :  { %v1122_v37 = vpop.permute.xlu0 %1121 }
0x1243   :  { %v1124_v40 = vpop.permute.xlu1 %1123  ;;  %v1127_v41 = vmul.f32 %v2952_v36, %v1122_v37  ;;  %v1332_v37 = vld [vmem:[#allocation7 + $0x10] sm:$0xff] }
0x1244   :  { %v1128_v42 = vmul.f32 %v2954_v39, %v1124_v40 }
0x1245   :  { %1131 = vrot.lane.b32.xlu0 %v1127_v41, %s3167_s3 }
0x1246   :  { %1133 = vrot.lane.b32.xlu1 %v1128_v42, %s3167_s3  ;;  %v1428_v42 = vld [vmem:[#allocation8 + $0x10] sm:$0xff] }
0x1247   :  { %v3493_v44 = vpack.c.bf16 %v1429_v43, %v1428_v42 }
0x12b7   :  { %v1132_v46 = vpop.permute.xlu0 %1131 }
0x12b8   :  { %v1134_v47 = vpop.permute.xlu1 %1133  ;;  %v1137_v12 = vadd.f32 %v1132_v46, %v1117_v45 }
0x12b9   :  { %v1138_v48 = vadd.f32 %v1134_v47, %v1118_v8 }
0x12ba   :  { %2955 = vtanh.f32 %v1137_v12  ;;  %v1253_v24 = vrot.slane %v1137_v12, 7 }
0x12bb   :  { %2957 = vtanh.f32 %v1138_v48  ;;  %v1254_v25 = vrot.slane %v1138_v48, 7 }
0x12c4   :  { %v2956_v49 = vpop.eup %2955 }
0x12c5   :  { %v2958_v51 = vpop.eup %2957  ;;  %1143 = vrot.lane.b32.xlu0 %v2956_v49, %s3166_s24 }
0x12c6   :  { %1145 = vrot.lane.b32.xlu1 %v2958_v51, %s3166_s24 }
0x1337   :  { %v1144_v52 = vpop.permute.xlu0 %1143 }
0x1338   :  { %v1146_v53 = vpop.permute.xlu1 %1145  ;;  %v1149_v54 = vmul.f32 %v2952_v36, %v1144_v52  ;;  %v1427_v36 = vld [vmem:[#allocation8 + $0x8] sm:$0xff] }
0x1339   :  { %v1150_v55 = vmul.f32 %v2954_v39, %v1146_v53  ;;  %v1333_v39 = vld [vmem:[#allocation7 + $0x18] sm:$0xff]  ;;  %v3489_v40 = vpack.c.bf16 %v1427_v36, %v1426_v34 }
0x133a   :  { %v1153_v56 = vrot.slane %v1149_v54, 6  ;;  %v1312_v57 = vrot.slane %v1149_v54, 2  ;;  %v2777_v41 = vpack.c.bf16 %v1333_v39, %v1332_v37 }
0x133b   :  { %v1154_v58 = vrot.slane %v1150_v55, 5  ;;  %v1313_v60 = vrot.slane %v1150_v55, 1 }
0x133c   :  { %2778 = vmatprep.subr.bf16.mxu1 %v2777_v41 }
0x133d   :  { %v1155_v61 = vsel %vm316_vm2, %v1154_v58, %v1153_v56  ;;  %v1314_v62 = vsel %vm1299_vm5, %v1313_v60, %v1312_v57  ;;  %2780 = vmatpush3.bf16.msra.mxu1 %v2777_v41  ;;  %v2401_v56 = vld [vmem:[%s3641_s6] ss:$0 sm:$0xff] }
0x133e   :  { %1156 = vrot.lane.b32.xlu0 %v1155_v61, %s3167_s3  ;;  %v3478_v2 = vsel %vm1323_vm7, %v1327_v63, %v1314_v62  ;;  %2787 = vmatprep.subr.bf16.mxu1 %v3163_v0 }
0x13b0   :  { %v1157_v3 = vpop.permute.xlu0 %1156 }
0x13b1   :  { %2609 = vmatmul.mubr.msk.f32.vlgmr.msra.gmra.mrb[8].mxu0 %vm185_vm3, %v1157_v3 }
0x13b2   :  { %2630 = vmatprep.mubr.msk.f32.mxu0 %vm3164_vm0, %v3165_v1  ;;  %2783 = vmatpush3.bf16.msra.mxu0 %v3489_v40 }
0x13b3   :  { %2784 = vmatprep.subr.bf16.mxu0 %v3163_v0 }
0x13b6   :  { %2786 = vmatpush3.bf16.msra.mxu0 %v3493_v44 }
0x13b7   :  { %2793 = vmatprep.subr.bf16.mxu0 %v3163_v0 }
0x13b9   :  { %2631 = vmatmul.mubr.f32.vlgmr.msra.gmra.mrb[10].mxu0 %v3165_v1 }
0x13ba   :  { %2795 = vmatpush3.bf16.msra.mxu0 %v3489_v40  ;;  %2652 = vmatprep.mubr.msk.f32.mxu0 %vm3164_vm0, %v3165_v1 }
0x13bb   :  { %2796 = vmatprep.subr.bf16.mxu0 %v3163_v0 }
0x13be   :  { %2798 = vmatpush3.bf16.msra.mxu0 %v3493_v44 }
0x13bf   :  { %2805 = vmatprep.subr.bf16.mxu0 %v3163_v0 }
0x1484   :  { %v1226_v4 = vpop.f32.mrb[8].mxu0 }
0x1485   :  { %v1231_v5 = vrot.slane %v1226_v4, 1  ;;  %v1232_v6 = vrot.slane %v1226_v4, 2  ;;  %v2610_v7 = vpop.f32.mrb[9].mxu0 }
0x1487   :  { %v1235_v9 = vadd.f32 %v1231_v5, %v3337_v20  ;;  %v1236_v10 = vadd.f32 %v1232_v6, %v3335_v16 }
0x1489   :  { %2959 = vtanh.f32 %v1235_v9  ;;  %v2399_v13 = vmul.f32 -1.442695, %v1235_v9  ;;  %v2400_v14 = vmul.f32 -1.442695, %v1236_v10 }
0x148a   :  { %2961 = vtanh.f32 %v1236_v10 }
0x148b   :  { %2963 = vpow2.f32 %v2399_v13 }
0x148c   :  { %2965 = vpow2.f32 %v2400_v14  ;;  %v1496_v54 = vpop.f32.mrb[10].mxu0 }
0x148d   :  { %v2632_v55 = vpop.f32.mrb[11].mxu0 }
0x1493   :  { %v2960_v38 = vpop.eup %2959 }
0x1494   :  { %v2962_v11 = vpop.eup %2961  ;;  %1261 = vrot.lane.b32.xlu1 %v2960_v38, %s3166_s24 }
0x1495   :  { %1263 = vrot.lane.b32.xlu0 %v2962_v11, %s3166_s24  ;;  %v2964_v15 = vpop.eup %2963 }
0x1496   :  { %v2966_v17 = vpop.eup %2965  ;;  %v1243_v50 = vadd.f32 1.0, %v2964_v15 }
0x1497   :  { %v1244_v18 = vadd.f32 1.0, %v2966_v17 }
0x1498   :  { %2967 = vrcp.f32 %v1243_v50 }
0x1499   :  { %2969 = vrcp.f32 %v1244_v18 }
0x14a2   :  { %v2968_v20 = vpop.eup %2967 }
0x14a3   :  { %v2970_v19 = vpop.eup %2969  ;;  %v1257_v26 = vmul.f32 %v2968_v20, %v1253_v24 }
0x14a4   :  { %v1258_v27 = vmul.f32 %v2970_v19, %v1254_v25 }
0x1506   :  { %v1262_v16 = vpop.permute.xlu1 %1261 }
0x1507   :  { %v1264_v21 = vpop.permute.xlu0 %1263  ;;  %v1267_v22 = vmul.f32 %v2968_v20, %v1262_v16 }
0x1508   :  { %v1268_v23 = vmul.f32 %v2970_v19, %v1264_v21 }
0x1509   :  { %1271 = vrot.lane.b32.xlu1 %v1267_v22, %s3167_s3 }
0x150a   :  { %1273 = vrot.lane.b32.xlu0 %v1268_v23, %s3167_s3 }
0x157b   :  { %v1272_v28 = vpop.permute.xlu1 %1271 }
0x157c   :  { %v1274_v29 = vpop.permute.xlu0 %1273  ;;  %v1277_v30 = vadd.f32 %v1272_v28, %v1257_v26 }
0x157d   :  { %v1278_v31 = vadd.f32 %v1274_v29, %v1258_v27 }
0x157e   :  { %2971 = vtanh.f32 %v1277_v30 }
0x157f   :  { %2973 = vtanh.f32 %v1278_v31 }
0x1588   :  { %v2972_v45 = vpop.eup %2971 }
0x1589   :  { %v2974_v8 = vpop.eup %2973  ;;  %1283 = vrot.lane.b32.xlu1 %v2972_v45, %s3166_s24 }
0x158a   :  { %1285 = vrot.lane.b32.xlu0 %v2974_v8, %s3166_s24 }
0x158d   :  { %1343 = vrot.lane.b32.xlu1 %v3424_v59, %s3167_s3 }
0x15fb   :  { %v1284_v46 = vpop.permute.xlu1 %1283 }
0x15fc   :  { %v1286_v47 = vpop.permute.xlu0 %1285  ;;  %v1289_v12 = vmul.f32 %v2968_v20, %v1284_v46 }
0x15fd   :  { %v1290_v48 = vmul.f32 %v2970_v19, %v1286_v47 }
0x15fe   :  { %v1318_v49 = vrot.slane %v1289_v12, 1 }
0x15ff   :  { %v1344_v51 = vpop.permute.xlu1 %1343 }
0x1600   :  { %2619 = vmatprep.mubr.msk.f32.mxu1 %vm185_vm3, %v1344_v51  ;;  %v1319_v59 = vsel %vm1304_vm8, %v1290_v48, %v1318_v49 }
0x1601   :  { %v1329_v52 = vsel %vm1325_vm9, %v3478_v2, %v1319_v59 }
0x1602   :  { %1345 = vrot.lane.b32.xlu0 %v1329_v52, %s3167_s3 }
0x1674   :  { %v1346_v53 = vpop.permute.xlu0 %1345 }
0x1675   :  { %2620 = vmatmul.mubr.msk.f32.vlgmr.msra.gmra.mrb[8].mxu1 %vm185_vm3, %v1346_v53 }
0x1676   :  { %2789 = vmatpush3.bf16.msra.mxu1 %v3489_v40  ;;  %2641 = vmatprep.mubr.msk.f32.mxu1 %vm3164_vm0, %v3165_v1 }
0x1677   :  { %2790 = vmatprep.subr.bf16.mxu1 %v3163_v0 }
0x167a   :  { %2792 = vmatpush3.bf16.msra.mxu1 %v3493_v44 }
0x167b   :  { %2799 = vmatprep.subr.bf16.mxu1 %v3163_v0 }
0x1748   :  { %v2621_v57 = vpop.f32.mrb[8].mxu1 }
0x1749   :  { %v3524_v58 = vadd.f32 %v2621_v57, %v2401_v56  ;;  %v1417_v60 = vpop.f32.mrb[9].mxu1 }
0x174a   :  { %v3526_v61 = vadd.f32 %v2401_v56, %v1417_v60 }
0x174c   :  { %v1500_v62 = vadd.f32 %v1496_v54, %v3526_v61 }
0x174e   :  { %2975 = vtanh.f32 %v1500_v62  ;;  %v2404_v2 = vmul.f32 -1.442695, %v1500_v62 }
0x1750   :  { %2977 = vpow2.f32 %v2404_v2 }
0x1758   :  { %v2976_v63 = vpop.eup %2975 }
0x1759   :  { %1510 = vrot.lane.b32.xlu1 %v2976_v63, %s3166_s24 }
0x175a   :  { %v2978_v3 = vpop.eup %2977 }
0x175b   :  { %v1504_v4 = vadd.f32 1.0, %v2978_v3 }
0x175d   :  { %2979 = vrcp.f32 %v1504_v4 }
0x1767   :  { %v2980_v5 = vpop.eup %2979 }
0x1768   :  { %v1508_v9 = vmul.f32 0.0, %v2980_v5 }
0x17cb   :  { %v1511_v6 = vpop.permute.xlu1 %1510 }
0x17cc   :  { %v1513_v7 = vmul.f32 %v2980_v5, %v1511_v6 }
0x17ce   :  { %1515 = vrot.lane.b32.xlu0 %v1513_v7, %s3167_s3 }
0x1840   :  { %v1516_v10 = vpop.permute.xlu0 %1515 }
0x1841   :  { %v1518_v38 = vadd.f32 %v1516_v10, %v1508_v9 }
0x1843   :  { %2981 = vtanh.f32 %v1518_v38  ;;  %v1612_v26 = vrot.slane %v1518_v38, 6 }
0x184d   :  { %v2982_v11 = vpop.eup %2981 }
0x184e   :  { %1521 = vrot.lane.b32.xlu1 %v2982_v11, %s3166_s24 }
0x18c0   :  { %v1522_v13 = vpop.permute.xlu1 %1521 }
0x18c1   :  { %v1524_v14 = vmul.f32 %v2980_v5, %v1522_v13 }
0x18c3   :  { %1526 = vrot.lane.b32.xlu0 %v1524_v14, %s3167_s3 }
0x1935   :  { %v1527_v15 = vpop.permute.xlu0 %1526 }
0x1936   :  { %2642 = vmatmul.mubr.msk.f32.vlgmr.msra.gmra.mrb[10].mxu1 %vm185_vm3, %v1527_v15 }
0x1937   :  { %2801 = vmatpush3.bf16.msra.mxu1 %v3489_v40  ;;  %2663 = vmatprep.mubr.msk.f32.mxu1 %vm3164_vm0, %v3165_v1 }
0x1938   :  { %2802 = vmatprep.subr.bf16.mxu1 %v3163_v0 }
0x193b   :  { %2804 = vmatpush3.bf16.msra.mxu1 %v3493_v44 }
0x193c   :  { %2811 = vmatprep.subr.bf16.mxu1 %v3163_v0 }
0x1a09   :  { %v1596_v17 = vpop.f32.mrb[10].mxu1 }
0x1a0a   :  { %v1601_v50 = vrot.slane %v1596_v17, 6  ;;  %v2643_v18 = vpop.f32.mrb[11].mxu1 }
0x1a0c   :  { %v1603_v20 = vadd.f32 %v1601_v50, %v3526_v61 }
0x1a0e   :  { %2983 = vtanh.f32 %v1603_v20  ;;  %v2406_v19 = vmul.f32 -1.442695, %v1603_v20 }
0x1a10   :  { %2985 = vpow2.f32 %v2406_v19 }
0x1a18   :  { %v2984_v16 = vpop.eup %2983 }
0x1a19   :  { %1616 = vrot.lane.b32.xlu1 %v2984_v16, %s3166_s24 }
0x1a1a   :  { %v2986_v21 = vpop.eup %2985 }
0x1a1b   :  { %v1607_v22 = vadd.f32 1.0, %v2986_v21 }
0x1a1d   :  { %2987 = vrcp.f32 %v1607_v22 }
0x1a27   :  { %v2988_v23 = vpop.eup %2987 }
0x1a28   :  { %v1614_v27 = vmul.f32 %v2988_v23, %v1612_v26 }
0x1a8b   :  { %v1617_v24 = vpop.permute.xlu1 %1616 }
0x1a8c   :  { %v1619_v25 = vmul.f32 %v2988_v23, %v1617_v24 }
0x1a8e   :  { %1621 = vrot.lane.b32.xlu0 %v1619_v25, %s3167_s3 }
0x1b00   :  { %v1622_v28 = vpop.permute.xlu0 %1621 }
0x1b01   :  { %v1624_v29 = vadd.f32 %v1622_v28, %v1614_v27 }
0x1b03   :  { %2989 = vtanh.f32 %v1624_v29  ;;  %v1719_v12 = vrot.slane %v1624_v29, 6 }
0x1b0d   :  { %v2990_v30 = vpop.eup %2989 }
0x1b0e   :  { %1627 = vrot.lane.b32.xlu1 %v2990_v30, %s3166_s24 }
0x1b80   :  { %v1628_v31 = vpop.permute.xlu1 %1627 }
0x1b81   :  { %v1630_v32 = vmul.f32 %v2988_v23, %v1628_v31 }
0x1b83   :  { %v1632_v33 = vrot.slane %v1630_v32, 2 }
0x1b85   :  { %1633 = vrot.lane.b32.xlu0 %v1632_v33, %s3167_s3 }
0x1bf7   :  { %v1634_v34 = vpop.permute.xlu0 %1633 }
0x1bf8   :  { %2653 = vmatmul.mubr.msk.f32.vlgmr.msra.gmra.mrb[12].mxu0 %vm185_vm3, %v1634_v34 }
0x1bf9   :  { %2807 = vmatpush3.bf16.msra.mxu0 %v3489_v40  ;;  %2674 = vmatprep.mubr.msk.f32.mxu0 %vm3164_vm0, %v3165_v1 }
0x1bfa   :  { %2808 = vmatprep.subr.bf16.mxu0 %v3163_v0 }
0x1bfd   :  { %2810 = vmatpush3.bf16.msra.mxu0 %v3493_v44 }
0x1bfe   :  { %2817 = vmatprep.subr.bf16.mxu0 %v3163_v0 }
0x1ccb   :  { %v1703_v35 = vpop.f32.mrb[12].mxu0 }
0x1ccc   :  { %v1708_v36 = vrot.slane %v1703_v35, 4  ;;  %v2654_v37 = vpop.f32.mrb[13].mxu0 }
0x1cce   :  { %v1710_v39 = vadd.f32 %v1708_v36, %v3526_v61 }
0x1cd0   :  { %2991 = vtanh.f32 %v1710_v39  ;;  %v2408_v42 = vmul.f32 -1.442695, %v1710_v39 }
0x1cd2   :  { %2993 = vpow2.f32 %v2408_v42 }
0x1cda   :  { %v2992_v41 = vpop.eup %2991 }
0x1cdb   :  { %1723 = vrot.lane.b32.xlu1 %v2992_v41, %s3166_s24 }
0x1cdc   :  { %v2994_v43 = vpop.eup %2993 }
0x1cdd   :  { %v1714_v45 = vadd.f32 1.0, %v2994_v43 }
0x1cdf   :  { %2995 = vrcp.f32 %v1714_v45 }
0x1ce9   :  { %v2996_v8 = vpop.eup %2995 }
0x1cea   :  { %v1721_v48 = vmul.f32 %v2996_v8, %v1719_v12 }
0x1d4d   :  { %v1724_v46 = vpop.permute.xlu1 %1723 }
0x1d4e   :  { %v1726_v47 = vmul.f32 %v2996_v8, %v1724_v46 }
0x1d50   :  { %1728 = vrot.lane.b32.xlu0 %v1726_v47, %s3167_s3 }
0x1dc2   :  { %v1729_v49 = vpop.permute.xlu0 %1728 }
0x1dc3   :  { %v1731_v51 = vadd.f32 %v1729_v49, %v1721_v48 }
0x1dc5   :  { %2997 = vtanh.f32 %v1731_v51  ;;  %v1826_v9 = vrot.slane %v1731_v51, 6 }
0x1dcf   :  { %v2998_v59 = vpop.eup %2997 }
0x1dd0   :  { %1734 = vrot.lane.b32.xlu1 %v2998_v59, %s3166_s24 }
0x1e42   :  { %v1735_v52 = vpop.permute.xlu1 %1734 }
0x1e43   :  { %v1737_v53 = vmul.f32 %v2996_v8, %v1735_v52 }
0x1e45   :  { %v1739_v54 = vrot.slane %v1737_v53, 4 }
0x1e47   :  { %1740 = vrot.lane.b32.xlu0 %v1739_v54, %s3167_s3 }
0x1eb9   :  { %v1741_v55 = vpop.permute.xlu0 %1740 }
0x1eba   :  { %2664 = vmatmul.mubr.msk.f32.vlgmr.msra.gmra.mrb[12].mxu1 %vm185_vm3, %v1741_v55 }
0x1ebb   :  { %2813 = vmatpush3.bf16.msra.mxu1 %v3489_v40  ;;  %2685 = vmatprep.mubr.msk.f32.mxu1 %vm3164_vm0, %v3165_v1 }
0x1ebc   :  { %2814 = vmatprep.subr.bf16.mxu1 %v3163_v0 }
0x1ebf   :  { %2816 = vmatpush3.bf16.msra.mxu1 %v3493_v44 }
0x1ec0   :  { %2823 = vmatprep.subr.bf16.mxu1 %v3163_v0 }
0x1f8d   :  { %v1810_v56 = vpop.f32.mrb[12].mxu1 }
0x1f8e   :  { %v1815_v57 = vrot.slane %v1810_v56, 2  ;;  %v2665_v60 = vpop.f32.mrb[13].mxu1 }
0x1f90   :  { %v1817_v62 = vadd.f32 %v1815_v57, %v3526_v61 }
0x1f92   :  { %2999 = vtanh.f32 %v1817_v62  ;;  %v2410_v2 = vmul.f32 -1.442695, %v1817_v62 }
0x1f94   :  { %3001 = vpow2.f32 %v2410_v2 }
0x1f9c   :  { %v3000_v63 = vpop.eup %2999 }
0x1f9d   :  { %1830 = vrot.lane.b32.xlu1 %v3000_v63, %s3166_s24 }
0x1f9e   :  { %v3002_v3 = vpop.eup %3001 }
0x1f9f   :  { %v1821_v4 = vadd.f32 1.0, %v3002_v3 }
0x1fa1   :  { %3003 = vrcp.f32 %v1821_v4 }
0x1fab   :  { %v3004_v5 = vpop.eup %3003 }
0x1fac   :  { %v1828_v10 = vmul.f32 %v3004_v5, %v1826_v9 }
0x200f   :  { %v1831_v6 = vpop.permute.xlu1 %1830 }
0x2010   :  { %v1833_v7 = vmul.f32 %v3004_v5, %v1831_v6 }
0x2012   :  { %1835 = vrot.lane.b32.xlu0 %v1833_v7, %s3167_s3 }
0x2084   :  { %v1836_v38 = vpop.permute.xlu0 %1835 }
0x2085   :  { %v1838_v11 = vadd.f32 %v1836_v38, %v1828_v10 }
0x2087   :  { %3005 = vtanh.f32 %v1838_v11  ;;  %v1930_v26 = vrot.slane %v1838_v11, 6 }
0x2091   :  { %v3006_v61 = vpop.eup %3005 }
0x2092   :  { %1841 = vrot.lane.b32.xlu1 %v3006_v61, %s3166_s24 }
0x2104   :  { %v1842_v13 = vpop.permute.xlu1 %1841 }
0x2105   :  { %v1844_v14 = vmul.f32 %v3004_v5, %v1842_v13 }
0x2107   :  { %v1846_v15 = vrot.slane %v1844_v14, 6 }
0x2109   :  { %1847 = vrot.lane.b32.xlu0 %v1846_v15, %s3167_s3 }
0x217b   :  { %v1848_v17 = vpop.permute.xlu0 %1847 }
0x217c   :  { %2675 = vmatmul.mubr.msk.f32.vlgmr.msra.gmra.mrb[14].mxu0 %vm185_vm3, %v1848_v17 }
0x217d   :  { %2819 = vmatpush3.bf16.msra.mxu0 %v3489_v40  ;;  %2696 = vmatprep.mubr.msk.f32.mxu0 %vm3164_vm0, %v3165_v1 }
0x217e   :  { %2820 = vmatprep.subr.bf16.mxu0 %v3163_v0 }
0x2181   :  { %2822 = vmatpush3.bf16.msra.mxu0 %v3493_v44 }
0x2182   :  { %2829 = vmatprep.subr.bf16.mxu0 %v3163_v0 }
0x224f   :  { %v1917_v50 = vpop.f32.mrb[14].mxu0 }
0x2250   :  { %v1921_v18 = vadd.f32 %v1917_v50, %v3524_v58  ;;  %v2676_v20 = vpop.f32.mrb[15].mxu0 }
0x2252   :  { %3007 = vtanh.f32 %v1921_v18  ;;  %v2412_v19 = vmul.f32 -1.442695, %v1921_v18 }
0x2254   :  { %3009 = vpow2.f32 %v2412_v19 }
0x225c   :  { %v3008_v16 = vpop.eup %3007 }
0x225d   :  { %1934 = vrot.lane.b32.xlu1 %v3008_v16, %s3166_s24 }
0x225e   :  { %v3010_v21 = vpop.eup %3009 }
0x225f   :  { %v1925_v22 = vadd.f32 1.0, %v3010_v21 }
0x2261   :  { %3011 = vrcp.f32 %v1925_v22 }
0x226b   :  { %v3012_v23 = vpop.eup %3011 }
0x226c   :  { %v1932_v27 = vmul.f32 %v3012_v23, %v1930_v26 }
0x22cf   :  { %v1935_v24 = vpop.permute.xlu1 %1934 }
0x22d0   :  { %v1937_v25 = vmul.f32 %v3012_v23, %v1935_v24 }
0x22d2   :  { %1939 = vrot.lane.b32.xlu0 %v1937_v25, %s3167_s3 }
0x2344   :  { %v1940_v28 = vpop.permute.xlu0 %1939 }
0x2345   :  { %v1942_v29 = vadd.f32 %v1940_v28, %v1932_v27  ;;  %v2270_v27 = vld [vmem:[%s3642_s7 + $0x8] sm:$0xff]  ;;  %v2271_v28 = vld [vmem:[%s3642_s7 + $0x10] sm:$0xff] }
0x2347   :  { %3013 = vtanh.f32 %v1942_v29 }
0x2351   :  { %v3014_v30 = vpop.eup %3013 }
0x2352   :  { %1945 = vrot.lane.b32.xlu1 %v3014_v30, %s3166_s24  ;;  %v2272_v30 = vld [vmem:[%s3642_s7 + $0x18] sm:$0xff] }
0x23c4   :  { %v1946_v31 = vpop.permute.xlu1 %1945 }
0x23c5   :  { %v1948_v32 = vmul.f32 %v3012_v23, %v1946_v31  ;;  %v2833_v31 = vpack.c.bf16 %v2272_v30, %v2271_v28 }
0x23c7   :  { %1950 = vrot.lane.b32.xlu0 %v1948_v32, %s3167_s3 }
0x2439   :  { %v1951_v33 = vpop.permute.xlu0 %1950 }
0x243a   :  { %2686 = vmatmul.mubr.msk.f32.vlgmr.msra.gmra.mrb[14].mxu1 %vm185_vm3, %v1951_v33 }
0x243b   :  { %2825 = vmatpush3.bf16.msra.mxu1 %v3489_v40  ;;  %2707 = vmatprep.mubr.msk.f32.mxu1 %vm3164_vm0, %v3165_v1 }
0x243c   :  { %2826 = vmatprep.subr.bf16.mxu1 %v3163_v0 }
0x243f   :  { %2828 = vmatpush3.bf16.msra.mxu1 %v3493_v44  ;;  %v2036_v44 = vrot.slane %v1942_v29, 6 }
0x250d   :  { %v2020_v34 = vpop.f32.mrb[14].mxu1 }
0x250e   :  { %v2025_v35 = vrot.slane %v2020_v34, 6  ;;  %v2687_v36 = vpop.f32.mrb[15].mxu1 }
0x2510   :  { %v2027_v37 = vadd.f32 %v2025_v35, %v3524_v58 }
0x2512   :  { %3015 = vtanh.f32 %v2027_v37  ;;  %v2414_v41 = vmul.f32 -1.442695, %v2027_v37  ;;  %v2419_v37 = vld [vmem:[%s3643_s8] ss:$0 sm:$0xff] }
0x2514   :  { %3017 = vpow2.f32 %v2414_v41 }
0x251c   :  { %v3016_v39 = vpop.eup %3015 }
0x251d   :  { %2040 = vrot.lane.b32.xlu1 %v3016_v39, %s3166_s24 }
0x251e   :  { %v3018_v42 = vpop.eup %3017 }
0x251f   :  { %v2031_v40 = vadd.f32 1.0, %v3018_v42 }
0x2521   :  { %3019 = vrcp.f32 %v2031_v40 }
0x252b   :  { %v3020_v43 = vpop.eup %3019 }
0x252c   :  { %v2038_v46 = vmul.f32 %v3020_v43, %v2036_v44 }
0x258f   :  { %v2041_v45 = vpop.permute.xlu1 %2040 }
0x2590   :  { %v2043_v8 = vmul.f32 %v3020_v43, %v2041_v45 }
0x2592   :  { %2045 = vrot.lane.b32.xlu0 %v2043_v8, %s3167_s3 }
0x2604   :  { %v2046_v47 = vpop.permute.xlu0 %2045 }
0x2605   :  { %v2048_v12 = vadd.f32 %v2046_v47, %v2038_v46 }
0x2607   :  { %3021 = vtanh.f32 %v2048_v12 }
0x2611   :  { %v3022_v48 = vpop.eup %3021 }
0x2612   :  { %2051 = vrot.lane.b32.xlu1 %v3022_v48, %s3166_s24 }
0x2684   :  { %v2052_v49 = vpop.permute.xlu1 %2051 }
0x2685   :  { %v2054_v51 = vmul.f32 %v3020_v43, %v2052_v49 }
0x2687   :  { %v2056_v59 = vrot.slane %v2054_v51, 2 }
0x2689   :  { %2057 = vrot.lane.b32.xlu0 %v2056_v59, %s3167_s3 }
0x26fb   :  { %v2058_v52 = vpop.permute.xlu0 %2057 }
0x26fc   :  { %2697 = vmatmul.mubr.msk.f32.vlgmr.msra.gmra.mrb[16].mxu0 %vm185_vm3, %v2058_v52 }
0x26fd   :  { %2718 = vmatprep.mubr.msk.f32.mxu0 %vm3164_vm0, %v3165_v1  ;;  %v2143_v1 = vrot.slane %v2048_v12, 6 }
0x27cf   :  { %v2127_v53 = vpop.f32.mrb[16].mxu0 }
0x27d0   :  { %v2132_v54 = vrot.slane %v2127_v53, 4  ;;  %v2698_v55 = vpop.f32.mrb[17].mxu0 }
0x27d2   :  { %v2134_v56 = vadd.f32 %v2132_v54, %v3524_v58 }
0x27d4   :  { %3023 = vtanh.f32 %v2134_v56  ;;  %v2416_v60 = vmul.f32 -1.442695, %v2134_v56 }
0x27d6   :  { %3025 = vpow2.f32 %v2416_v60 }
0x27de   :  { %v3024_v57 = vpop.eup %3023 }
0x27df   :  { %2147 = vrot.lane.b32.xlu1 %v3024_v57, %s3166_s24 }
0x27e0   :  { %v3026_v62 = vpop.eup %3025 }
0x27e1   :  { %v2138_v63 = vadd.f32 1.0, %v3026_v62 }
0x27e3   :  { %3027 = vrcp.f32 %v2138_v63 }
0x27ed   :  { %v3028_v2 = vpop.eup %3027 }
0x27ee   :  { %v2145_v5 = vmul.f32 %v3028_v2, %v2143_v1 }
0x2851   :  { %v2148_v3 = vpop.permute.xlu1 %2147 }
0x2852   :  { %v2150_v4 = vmul.f32 %v3028_v2, %v2148_v3 }
0x2854   :  { %2152 = vrot.lane.b32.xlu0 %v2150_v4, %s3167_s3 }
0x28c6   :  { %v2153_v6 = vpop.permute.xlu0 %2152 }
0x28c7   :  { %v2155_v7 = vadd.f32 %v2153_v6, %v2145_v5 }
0x28c9   :  { %3029 = vtanh.f32 %v2155_v7  ;;  %v2250_v23 = vrot.slane %v2155_v7, 6 }
0x28d3   :  { %v3030_v9 = vpop.eup %3029 }
0x28d4   :  { %2158 = vrot.lane.b32.xlu1 %v3030_v9, %s3166_s24 }
0x2946   :  { %v2159_v10 = vpop.permute.xlu1 %2158 }
0x2947   :  { %v2161_v38 = vmul.f32 %v3028_v2, %v2159_v10 }
0x2949   :  { %v2163_v11 = vrot.slane %v2161_v38, 4 }
0x294b   :  { %2164 = vrot.lane.b32.xlu0 %v2163_v11, %s3167_s3 }
0x29bd   :  { %v2165_v61 = vpop.permute.xlu0 %2164 }
0x29be   :  { %2708 = vmatmul.mubr.msk.f32.vlgmr.msra.gmra.mrb[16].mxu1 %vm185_vm3, %v2165_v61 }
0x2a91   :  { %v2234_v13 = vpop.f32.mrb[16].mxu1 }
0x2a92   :  { %v2239_v14 = vrot.slane %v2234_v13, 2  ;;  %v2709_v15 = vpop.f32.mrb[17].mxu1 }
0x2a94   :  { %v2241_v17 = vadd.f32 %v2239_v14, %v3524_v58  ;;  %v2269_v58 = vld [vmem:[%s3642_s7] sm:$0xff]  ;;  %s3168_s7 = smov [#allocation10]  }
0x2a95   :  { %v2830_v29 = vpack.c.bf16 %v2270_v27, %v2269_v58  ;;  %s2364_s10 = sshll.u32 %s3168_s7, 4  ;;  %s2365_s10 = int_to_ptr.vmem [resolvable:$true] %s2364_s10 }
0x2a96   :  { %3031 = vtanh.f32 %v2241_v17  ;;  %v2418_v18 = vmul.f32 -1.442695, %v2241_v17  ;;  %s3127_s14 = scalar_lea.vmem %s2365_s10, 32  ;;  %p3132_p5 = scmp.lt.s32.totalorder %s2365_s10, %s2365_s10 }
0x2a97   :  { %2831 = vmatpush3.bf16.msra.mxu0 %v2830_v29  ;;  %p3128_p4 = scmp.ne.s32.totalorder %s2365_s10, %s3127_s14  ;;  %p3133_p6 = scmp.lt.s32.totalorder %s3127_s14, %s3127_s14 }
0x2a98   :  { %3033 = vpow2.f32 %v2418_v18  ;;  %2832 = vmatprep.subr.bf16.mxu0 %v3163_v0 }
0x2a99   :  { %p3134_p7 = por %p3133_p6, %p3132_p5 }
0x2a9b   :  { %2834 = vmatpush3.bf16.msra.mxu0 %v2833_v31  ;;  %p3135_p8 = pnand %p3134_p7, %p3128_p4 }
0x2aa0   :  { %v3032_v50 = vpop.eup %3031 }
0x2aa1   :  { %2254 = vrot.lane.b32.xlu1 %v3032_v50, %s3166_s24 }
0x2aa2   :  { %v3034_v20 = vpop.eup %3033 }
0x2aa3   :  { %v2245_v16 = vadd.f32 1.0, %v3034_v20 }
0x2aa5   :  { %3035 = vrcp.f32 %v2245_v16 }
0x2aaf   :  { %v3036_v19 = vpop.eup %3035 }
0x2ab0   :  { %v2252_v24 = vmul.f32 %v3036_v19, %v2250_v23 }
0x2b13   :  { %v2255_v21 = vpop.permute.xlu1 %2254 }
0x2b14   :  { %v2257_v22 = vmul.f32 %v3036_v19, %v2255_v21 }
0x2b16   :  { %2259 = vrot.lane.b32.xlu0 %v2257_v22, %s3167_s3 }
0x2b88   :  { %v2260_v25 = vpop.permute.xlu0 %2259 }
0x2b89   :  { %v2262_v26 = vadd.f32 %v2260_v25, %v2252_v24 }
0x2b8b   :  { %3037 = vtanh.f32 %v2262_v26 }
0x2b95   :  { %v3038_v32 = vpop.eup %3037 }
0x2b96   :  { %2265 = vrot.lane.b32.xlu1 %v3038_v32, %s3166_s24 }
0x2c08   :  { %v2266_v33 = vpop.permute.xlu1 %2265 }
0x2c09   :  { %v2268_v34 = vmul.f32 %v3036_v19, %v2266_v33 }
0x2c0b   :  { %v2281_v35 = vrot.slane %v2268_v34, 6 }
0x2c0d   :  { %2282 = vrot.lane.b32.xlu0 %v2281_v35, %s3167_s3 }
0x2c7f   :  { %v2283_v36 = vpop.permute.xlu0 %2282 }
0x2c80   :  { %2719 = vmatmul.mubr.msk.f32.vlgmr.msra.gmra.mrb[18].mxu0 %vm185_vm3, %v2283_v36 }
0x2d53   :  { %v2352_v39 = vpop.f32.mrb[18].mxu0 }
0x2d54   :  { %v2353_v0 = vadd.f32 %v2419_v37, %v2352_v39  ;;  %v2720_v41 = vpop.f32.mrb[19].mxu0 }
0x2d56   :  { %2357 = vst.msk [vmem:[#allocation10] sm:$0x3] %vm2356_vm10, %v2353_v0 }
0x2d57   :  { %3138 = shalt.err (!%p3135_p8)
}
0x2d58   :  { %s3139_s16 = scalar_lea.hbm %s3644_s9, 32 }
0x2d59   :  { %p3140_p9 = scmp.ne.s32.totalorder %s3644_s9, %s3139_s16  ;;  %p3143_p10 = scmp.lt.u32.totalorder %s3139_s16, %s3644_s9 }
0x2d5b   :  { %p3145_p11 = pnand %p3143_p10, %p3140_p9 }
0x2d5d   :  { %3148 = shalt.err (!%p3145_p11)
}
0x2d5e   :  { %2367 = dma.vmem_to_hbm [thread:$0]  %s2365_s10, 32, %s3644_s9, [#allocation4]  }
0x2d5f   :  { %3155 = dma.done.wait [#allocation4], 32  }
0x2d60   :  { %3156 = vsyncadd [#allocation4], 4294967264 }
0x2d61   :  { %2371 = vsyncpa [#allocation3], 1 }
0x2d62   :  { %2372 = vsyncpa [#allocation6], 1 }
0x2d63   :  { %2373 = vsyncpa [#allocation9], 1 }
0x2d64   :  { %2374 = vsyncpa [#allocation4], 1 }

</bundles_post_ra>
